<compile_context>
chip_gen: v7x
topology: tpu7x:2x2x1
jax: 0.10.0
libtpu: 0.0.40
codegen_flags: <defaults>
</compile_context>

<pallas_src>
import jax
import jax.numpy as jnp
from jax.experimental import pallas as pl
from jax.experimental.pallas import tpu as pltpu

LANE = 128


def _round_up(n, m):
    return ((n + m - 1) // m) * m


# ----------------------------------------------------------------------------
# Fused multi-block TCN kernel
# ----------------------------------------------------------------------------
def _make_tcn_kernel(metas, tile_t, n_weight_refs, act_dtype):
    def kernel(*args):
        x_ref = args[0]
        w_refs = args[1:1 + n_weight_refs]
        o_ref = args[1 + n_weight_refs]
        scratch = args[2 + n_weight_refs:]          # [xin_0, hin_0, xin_1, hin_1, ...]

        j = pl.program_id(1)

        # First T tile of this batch row: zero the causal halo heads of every layer.
        @pl.when(j == 0)
        def _():
            for l, m in enumerate(metas):
                xin = scratch[2 * l]
                hin = scratch[2 * l + 1]
                xin[pl.ds(0, m["hp1"]), :] = jnp.zeros((m["hp1"], m["cin_p"]), act_dtype)
                hin[pl.ds(0, m["hp2"]), :] = jnp.zeros((m["hp2"], m["cout_p"]), act_dtype)

        cur = x_ref[0]                               # (tile_t, cin_p0)

        widx = 0
        for l, m in enumerate(metas):
            K, d1, d2 = m["K"], m["d1"], m["d2"]
            halo1, halo2 = m["halo1"], m["halo2"]
            hp1, hp2 = m["hp1"], m["hp2"]
            xin = scratch[2 * l]
            hin = scratch[2 * l + 1]

            w1 = w_refs[widx]
            b1 = w_refs[widx + 1]
            w2 = w_refs[widx + 2]
            b2 = w_refs[widx + 3]
            widx += 4
            if not m["identity"]:
                wd = w_refs[widx]
                widx += 1

            # ---- conv1 (causal, dilation d1) + bias + ReLU -------------------
            # Stage the current tile into the window tail (sublane-aligned store).
            xin[pl.ds(hp1, tile_t), :] = cur
            # K accumulating MXU matmuls; taps read straight from the window.
            acc = jnp.dot(xin[pl.ds(hp1 - halo1, tile_t), :], w1[0],
                          preferred_element_type=jnp.float32)
            for k in range(1, K):
                acc = acc + jnp.dot(xin[pl.ds(hp1 - halo1 + k * d1, tile_t), :], w1[k],
                                    preferred_element_type=jnp.float32)
            h = jnp.maximum(acc + b1[...], 0.0).astype(act_dtype)

            # ---- conv2 (causal, dilation d2) + residual + bias + final ReLU --
            hin[pl.ds(hp2, tile_t), :] = h
            acc2 = jnp.dot(hin[pl.ds(hp2 - halo2, tile_t), :], w2[0],
                           preferred_element_type=jnp.float32)
            for k in range(1, K):
                acc2 = acc2 + jnp.dot(hin[pl.ds(hp2 - halo2 + k * d2, tile_t), :], w2[k],
                                      preferred_element_type=jnp.float32)
            acc2 = acc2 + b2[...]
            if m["identity"]:
                acc2 = acc2 + cur.astype(jnp.float32)
            else:
                # 1x1 projection residual = one extra accumulating matmul.
                acc2 = acc2 + jnp.dot(cur, wd[...], preferred_element_type=jnp.float32)
            cur = jnp.maximum(acc2, 0.0).astype(act_dtype)

            # ---- causal carry for the next T tile ----------------------------
            # head <- last hp rows of the window (aligned load at tile_t, aligned
            # store at 0; value is read before the store, so this is correct even
            # when halo > tile_t).
            xin[pl.ds(0, hp1), :] = xin[pl.ds(tile_t, hp1), :]
            hin[pl.ds(0, hp2), :] = hin[pl.ds(tile_t, hp2), :]

        o_ref[0] = cur

    return kernel


# ----------------------------------------------------------------------------
# Parameters (PyTorch-like), packing (lane padding), fused forward
# ----------------------------------------------------------------------------
def init_tcn_params(key, num_inputs, num_channels, kernel_size, repeat):
    params = []
    in_c = num_inputs
    for i, out_c in enumerate(num_channels):
        key, k1, k2, k3, k4, k5, k6 = jax.random.split(key, 7)
        p = {
            "w1": 0.2 * jax.random.normal(k1, (kernel_size, in_c, out_c), jnp.float32),
            "b1": 0.1 * jax.random.normal(k2, (1, out_c), jnp.float32),
            "w2": 0.2 * jax.random.normal(k3, (kernel_size, out_c, out_c), jnp.float32),
            "b2": 0.1 * jax.random.normal(k4, (1, out_c), jnp.float32),
            "d1": repeat[2 * i],
            "d2": repeat[2 * i + 1],
        }
        if in_c != out_c:  # 1x1 downsample conv on the residual path
            p["wd"] = 0.2 * jax.random.normal(k5, (in_c, out_c), jnp.float32)
            p["bd"] = 0.1 * jax.random.normal(k6, (1, out_c), jnp.float32)
        params.append(p)
        in_c = out_c
    return params


def pack_tcn_params(params, *, dtype, sub):
    """Pad channels to 128-lane multiples; fold the 1x1-projection bias into b2."""
    packed = []
    for p in params:
        K, in_c, out_c = p["w1"].shape
        assert K >= 2, "kernel_size must be >= 2"
        cin_p = _round_up(in_c, LANE)
        cout_p = _round_up(out_c, LANE)
        d1, d2 = p["d1"], p["d2"]
        halo1 = (K - 1) * d1
        halo2 = (K - 1) * d2

        w1 = jnp.zeros((K, cin_p, cout_p), dtype).at[:, :in_c, :out_c].set(
            p["w1"].astype(dtype))
        b1 = jnp.zeros((1, cout_p), dtype).at[:, :out_c].set(p["b1"].astype(dtype))
        w2 = jnp.zeros((K, cout_p, cout_p), dtype).at[:, :out_c, :out_c].set(
            p["w2"].astype(dtype))

        identity = "wd" not in p
        if identity:
            b2 = jnp.zeros((1, cout_p), dtype).at[:, :out_c].set(p["b2"].astype(dtype))
            wd = None
        else:
            wd = jnp.zeros((cin_p, cout_p), dtype).at[:in_c, :out_c].set(
                p["wd"].astype(dtype))
            b2 = jnp.zeros((1, cout_p), dtype).at[:, :out_c].set(
                (p["b2"] + p["bd"]).astype(dtype))

        packed.append(dict(
            w1=w1, b1=b1, w2=w2, b2=b2, wd=wd,
            K=K, d1=d1, d2=d2,
            halo1=halo1, halo2=halo2,
            hp1=_round_up(halo1, sub), hp2=_round_up(halo2, sub),
            cin_p=cin_p, cout_p=cout_p, identity=identity))
    return packed


def tcn_forward(x_ncw, params, *, tile_t=512, dtype=jnp.bfloat16):
    """x_ncw: PyTorch NCW (B, C, T). Returns (B, C_out, T) in `dtype`."""
    sub = 16 if dtype == jnp.bfloat16 else 8
    assert tile_t % sub == 0, "tile_t must be a multiple of the sublane packing"

    packed = pack_tcn_params(params, dtype=dtype, sub=sub)
    B, C_in, T = x_ncw.shape
    cin_p0 = packed[0]["cin_p"]
    cout_last = packed[-1]["cout_p"]
    T_pad = _round_up(T, tile_t)

    # Single boundary transpose + pad (channels -> multiple of 128 lanes, T -> tile).
    x = jnp.transpose(x_ncw, (0, 2, 1)).astype(dtype)
    x = jnp.pad(x, ((0, 0), (0, T_pad - T), (0, cin_p0 - C_in)))

    # Flatten weights / specs / per-block metadata.
    weight_arrays, weight_specs, metas, scratch_shapes = [], [], [], []
    for bp in packed:
        names = ("w1", "b1", "w2", "b2") + (() if bp["identity"] else ("wd",))
        for name in names:
            w = bp[name]
            weight_arrays.append(w)
            # Weights are grid-invariant; (could single-buffer via pl.Buffered(1),
            # negligible here at C=128 so default pipelining is kept.)
            weight_specs.append(
                pl.BlockSpec(w.shape, (lambda nd: (lambda b, j: (0,) * nd))(w.ndim)))
        metas.append({k: bp[k] for k in ("K", "d1", "d2", "halo1", "halo2",
                                         "hp1", "hp2", "cin_p", "cout_p", "identity")})
        scratch_shapes.append(pltpu.VMEM((bp["hp1"] + tile_t, bp["cin_p"]), dtype))
        scratch_shapes.append(pltpu.VMEM((bp["hp2"] + tile_t, bp["cout_p"]), dtype))

    n_w = len(weight_arrays)
    kernel = _make_tcn_kernel(metas, tile_t, n_w, dtype)

    # Cost estimate + VMEM budget.
    itemsize = jnp.dtype(dtype).itemsize
    flops = 0
    for m in metas:
        per_t = 2 * m["K"] * (m["cin_p"] + m["cout_p"]) * m["cout_p"]
        if not m["identity"]:
            per_t += 2 * m["cin_p"] * m["cout_p"]
        flops += B * T_pad * per_t
    w_bytes = sum(int(w.size) * itemsize for w in weight_arrays)
    bytes_accessed = itemsize * B * T_pad * (cin_p0 + cout_last) + w_bytes
    scr_bytes = sum((m["hp1"] + tile_t) * m["cin_p"] +
                    (m["hp2"] + tile_t) * m["cout_p"] for m in metas) * itemsize
    act_bytes = 2 * 2 * tile_t * (cin_p0 + cout_last) * itemsize   # double-buffered I/O
    vmem_budget = act_bytes + 2 * w_bytes + scr_bytes
    # Headroom, capped so it is still valid on v7x's 64 MiB physical VMEM.
    vmem_limit = int(min(max(32 * 1024 * 1024, 2 * vmem_budget), 48 * 1024 * 1024))

    out = pl.pallas_call(
        kernel,
        out_shape=jax.ShapeDtypeStruct((B, T_pad, cout_last), dtype),
        grid=(B, T_pad // tile_t),
        in_specs=[pl.BlockSpec((1, tile_t, cin_p0), lambda b, j: (b, j, 0))]
                 + weight_specs,
        out_specs=pl.BlockSpec((1, tile_t, cout_last), lambda b, j: (b, j, 0)),
        scratch_shapes=scratch_shapes,
        compiler_params=pltpu.CompilerParams(
            dimension_semantics=("parallel", "arbitrary"),
            vmem_limit_bytes=vmem_limit),
        cost_estimate=pl.CostEstimate(flops=int(flops), transcendentals=0,
                                      bytes_accessed=int(bytes_accessed)),
    )(x, *weight_arrays)

    out_c = params[-1]["w2"].shape[2]
    out = out[:, :T, :out_c]
    return jnp.transpose(out, (0, 2, 1))   # back to NCW (B, C_out, T)


# ----------------------------------------------------------------------------
# Pure-JAX reference (for correctness check)
# ----------------------------------------------------------------------------
def _ref_causal_conv1d(x_btc, w_kio, b_1o, dilation):
    K = w_kio.shape[0]
    T = x_btc.shape[1]
    pad = (K - 1) * dilation
    xpad = jnp.pad(x_btc, ((0, 0), (pad, 0), (0, 0)))
    taps = jnp.stack(
        [xpad[:, k * dilation:k * dilation + T, :] for k in range(K)], axis=0)
    return jnp.einsum("kbti,kio->bto", taps, w_kio) + b_1o[None]


def _ref_block(x_btc, p):
    h = jax.nn.relu(_ref_causal_conv1d(x_btc, p["w1"], p["b1"], p["d1"]))
    o = _ref_causal_conv1d(h, p["w2"], p["b2"], p["d2"])
    if "wd" in p:
        res = jnp.einsum("bti,io->bto", x_btc, p["wd"]) + p["bd"][None]
    else:
        res = x_btc
    return jax.nn.relu(o + res)


def _ref_forward(x_ncw, params):
    x = jnp.transpose(x_ncw, (0, 2, 1))
    for p in params:
        x = _ref_block(x, p)
    return jnp.transpose(x, (0, 2, 1))


# ----------------------------------------------------------------------------
if __name__ == "__main__":
    key = jax.random.PRNGKey(0)
    B, C_in, T = 2, 4, 32
    num_channels = [8, 8]            # two TCNBlocks: 4->8 (proj residual), 8->8 (identity)
    kernel_size = 3
    repeat = [1, 2, 5, 9] * 4        # default from the module
    tile_t = 16                      # two T tiles per batch -> exercises the causal carry
                                     # (block 1 has halo > tile_t)

    k_x, k_p = jax.random.split(key)
    x = jax.random.normal(k_x, (B, C_in, T), jnp.float32)   # PyTorch NCW input
    params = init_tcn_params(k_p, C_in, num_channels, kernel_size, repeat)

    ref = _ref_forward(x, params)

    # f32 path: strict correctness check against the pure-JAX reference.
    out = jax.block_until_ready(
        tcn_forward(x, params, tile_t=tile_t, dtype=jnp.float32))
    assert out.shape == (B, num_channels[-1], T)
    if not jnp.allclose(out, ref, atol=1e-4, rtol=1e-4):
        raise AssertionError("Pallas TCN (f32) output does not match JAX reference")

    # bf16 path (production default: native MXU dtype, f32 accumulation).
    out_bf16 = jax.block_until_ready(
        tcn_forward(x, params, tile_t=tile_t, dtype=jnp.bfloat16))
    if not jnp.allclose(out_bf16.astype(jnp.float32), ref, atol=1e-1, rtol=1e-1):
        raise AssertionError("Pallas TCN (bf16) output deviates too far from reference")

    print("KERNEL_OK")
</pallas_src>

<mosaic_0001>
module attributes {stable_mosaic.version = 11 : i64} {
  func.func @kernel(%arg0: i32, %arg1: i32, %arg2: memref<1x16x128xf32, #tpu.memory_space<vmem>>, %arg3: memref<3x128x128xf32, #tpu.memory_space<vmem>>, %arg4: memref<1x128xf32, #tpu.memory_space<vmem>>, %arg5: memref<3x128x128xf32, #tpu.memory_space<vmem>>, %arg6: memref<1x128xf32, #tpu.memory_space<vmem>>, %arg7: memref<128x128xf32, #tpu.memory_space<vmem>>, %arg8: memref<3x128x128xf32, #tpu.memory_space<vmem>>, %arg9: memref<1x128xf32, #tpu.memory_space<vmem>>, %arg10: memref<3x128x128xf32, #tpu.memory_space<vmem>>, %arg11: memref<1x128xf32, #tpu.memory_space<vmem>>, %arg12: memref<1x16x128xf32, #tpu.memory_space<vmem>>, %arg13: memref<24x128xf32, #tpu.memory_space<vmem>>, %arg14: memref<24x128xf32, #tpu.memory_space<vmem>>, %arg15: memref<32x128xf32, #tpu.memory_space<vmem>>, %arg16: memref<40x128xf32, #tpu.memory_space<vmem>>) attributes {dimension_semantics = [#tpu.dimension_semantics<parallel>, #tpu.dimension_semantics<arbitrary>], iteration_bounds = array<i64: 2, 2>, scalar_prefetch = 0 : i64, scratch_operands = 4 : i64, tpu.core_type = #tpu.core_type<tc>, window_params = [{transform_indices = @transform_0, window_bounds = array<i64: 1, 16, 128>}, {pipeline_mode = #tpu.pipeline_mode<synchronous>, transform_indices = @transform_1, window_bounds = array<i64: 3, 128, 128>}, {pipeline_mode = #tpu.pipeline_mode<synchronous>, transform_indices = @transform_2, window_bounds = array<i64: 1, 128>}, {pipeline_mode = #tpu.pipeline_mode<synchronous>, transform_indices = @transform_3, window_bounds = array<i64: 3, 128, 128>}, {pipeline_mode = #tpu.pipeline_mode<synchronous>, transform_indices = @transform_4, window_bounds = array<i64: 1, 128>}, {pipeline_mode = #tpu.pipeline_mode<synchronous>, transform_indices = @transform_5, window_bounds = array<i64: 128, 128>}, {pipeline_mode = #tpu.pipeline_mode<synchronous>, transform_indices = @transform_6, window_bounds = array<i64: 3, 128, 128>}, {pipeline_mode = #tpu.pipeline_mode<synchronous>, transform_indices = @transform_7, window_bounds = array<i64: 1, 128>}, {pipeline_mode = #tpu.pipeline_mode<synchronous>, transform_indices = @transform_8, window_bounds = array<i64: 3, 128, 128>}, {pipeline_mode = #tpu.pipeline_mode<synchronous>, transform_indices = @transform_9, window_bounds = array<i64: 1, 128>}, {transform_indices = @transform_10, window_bounds = array<i64: 1, 16, 128>}]} {
    %c0_i32 = arith.constant 0 : i32
    %0 = arith.cmpi eq, %arg1, %c0_i32 : i32
    %1 = arith.extui %0 : i1 to i32
    %c0_i32_0 = arith.constant 0 : i32
    %2 = arith.cmpi ne, %1, %c0_i32_0 : i32
    scf.if %2 {
      %cst_106 = arith.constant 0.000000e+00 : f32
      %100 = vector.broadcast %cst_106 : f32 to vector<8x128xf32>
      %c0_107 = arith.constant 0 : index
      %c0_108 = arith.constant 0 : index
      %101 = vector.load %arg13[%c0_107, %c0_108] : memref<24x128xf32, #tpu.memory_space<vmem>>, vector<8x128xf32>
      tpu.vector_store %arg13[%c0_107, %c0_108], %100 {strides = array<i32>} : memref<24x128xf32, #tpu.memory_space<vmem>>, vector<8x128xf32>,
      %cst_109 = arith.constant 0.000000e+00 : f32
      %102 = vector.broadcast %cst_109 : f32 to vector<8x128xf32>
      %c0_110 = arith.constant 0 : index
      %c0_111 = arith.constant 0 : index
      %103 = vector.load %arg14[%c0_110, %c0_111] : memref<24x128xf32, #tpu.memory_space<vmem>>, vector<8x128xf32>
      tpu.vector_store %arg14[%c0_110, %c0_111], %102 {strides = array<i32>} : memref<24x128xf32, #tpu.memory_space<vmem>>, vector<8x128xf32>,
      %cst_112 = arith.constant 0.000000e+00 : f32
      %104 = vector.broadcast %cst_112 : f32 to vector<16x128xf32>
      %c0_113 = arith.constant 0 : index
      %c0_114 = arith.constant 0 : index
      %105 = vector.load %arg15[%c0_113, %c0_114] : memref<32x128xf32, #tpu.memory_space<vmem>>, vector<16x128xf32>
      tpu.vector_store %arg15[%c0_113, %c0_114], %104 {strides = array<i32>} : memref<32x128xf32, #tpu.memory_space<vmem>>, vector<16x128xf32>,
      %cst_115 = arith.constant 0.000000e+00 : f32
      %106 = vector.broadcast %cst_115 : f32 to vector<24x128xf32>
      %c0_116 = arith.constant 0 : index
      %c0_117 = arith.constant 0 : index
      %107 = vector.load %arg16[%c0_116, %c0_117] : memref<40x128xf32, #tpu.memory_space<vmem>>, vector<24x128xf32>
      tpu.vector_store %arg16[%c0_116, %c0_117], %106 {strides = array<i32>} : memref<40x128xf32, #tpu.memory_space<vmem>>, vector<24x128xf32>,
    } else {
    }
    %c0 = arith.constant 0 : index
    %c0_1 = arith.constant 0 : index
    %c0_2 = arith.constant 0 : index
    %3 = vector.load %arg2[%c0, %c0_1, %c0_2] : memref<1x16x128xf32, #tpu.memory_space<vmem>>, vector<1x16x128xf32>
    %4 = vector.shape_cast %3 : vector<1x16x128xf32> to vector<16x128xf32>
    %c8 = arith.constant 8 : index
    %c0_3 = arith.constant 0 : index
    %5 = vector.load %arg13[%c8, %c0_3] : memref<24x128xf32, #tpu.memory_space<vmem>>, vector<16x128xf32>
    tpu.vector_store %arg13[%c8, %c0_3], %4 {strides = array<i32>} : memref<24x128xf32, #tpu.memory_space<vmem>>, vector<16x128xf32>,
    %c6 = arith.constant 6 : index
    %c0_4 = arith.constant 0 : index
    %6 = vector.load %arg13[%c6, %c0_4] : memref<24x128xf32, #tpu.memory_space<vmem>>, vector<16x128xf32>
    %c0_5 = arith.constant 0 : index
    %c0_6 = arith.constant 0 : index
    %c0_7 = arith.constant 0 : index
    %7 = vector.load %arg3[%c0_5, %c0_6, %c0_7] : memref<3x128x128xf32, #tpu.memory_space<vmem>>, vector<1x128x128xf32>
    %8 = vector.shape_cast %7 : vector<1x128x128xf32> to vector<128x128xf32>
    %cst = arith.constant dense<0.000000e+00> : vector<16x128xf32>
    %9 = tpu.matmul %6, %8, %cst {dimension_numbers = #tpu.dot_dimension_numbers<[1], [0], [0], [1], [0, 0, 1, 1], [], []>} : vector<16x128xf32>, vector<128x128xf32>, vector<16x128xf32> -> vector<16x128xf32>
    %c7 = arith.constant 7 : index
    %c0_8 = arith.constant 0 : index
    %10 = vector.load %arg13[%c7, %c0_8] : memref<24x128xf32, #tpu.memory_space<vmem>>, vector<16x128xf32>
    %c1 = arith.constant 1 : index
    %c0_9 = arith.constant 0 : index
    %c0_10 = arith.constant 0 : index
    %11 = vector.load %arg3[%c1, %c0_9, %c0_10] : memref<3x128x128xf32, #tpu.memory_space<vmem>>, vector<1x128x128xf32>
    %12 = vector.shape_cast %11 : vector<1x128x128xf32> to vector<128x128xf32>
    %cst_11 = arith.constant dense<0.000000e+00> : vector<16x128xf32>
    %13 = tpu.matmul %10, %12, %cst_11 {dimension_numbers = #tpu.dot_dimension_numbers<[1], [0], [0], [1], [0, 0, 1, 1], [], []>} : vector<16x128xf32>, vector<128x128xf32>, vector<16x128xf32> -> vector<16x128xf32>
    %14 = arith.addf %9, %13 : vector<16x128xf32>
    %c8_12 = arith.constant 8 : index
    %c0_13 = arith.constant 0 : index
    %15 = vector.load %arg13[%c8_12, %c0_13] : memref<24x128xf32, #tpu.memory_space<vmem>>, vector<16x128xf32>
    %c2 = arith.constant 2 : index
    %c0_14 = arith.constant 0 : index
    %c0_15 = arith.constant 0 : index
    %16 = vector.load %arg3[%c2, %c0_14, %c0_15] : memref<3x128x128xf32, #tpu.memory_space<vmem>>, vector<1x128x128xf32>
    %17 = vector.shape_cast %16 : vector<1x128x128xf32> to vector<128x128xf32>
    %cst_16 = arith.constant dense<0.000000e+00> : vector<16x128xf32>
    %18 = tpu.matmul %15, %17, %cst_16 {dimension_numbers = #tpu.dot_dimension_numbers<[1], [0], [0], [1], [0, 0, 1, 1], [], []>} : vector<16x128xf32>, vector<128x128xf32>, vector<16x128xf32> -> vector<16x128xf32>
    %19 = arith.addf %14, %18 : vector<16x128xf32>
    %c0_17 = arith.constant 0 : index
    %c0_18 = arith.constant 0 : index
    %20 = vector.load %arg4[%c0_17, %c0_18] : memref<1x128xf32, #tpu.memory_space<vmem>>, vector<1x128xf32>
    %21 = vector.broadcast %20 : vector<1x128xf32> to vector<16x128xf32>
    %22 = arith.addf %19, %21 : vector<16x128xf32>
    %cst_19 = arith.constant 0.000000e+00 : f32
    %23 = vector.broadcast %cst_19 : f32 to vector<16x128xf32>
    %24 = arith.maximumf %22, %23 : vector<16x128xf32>
    %c8_20 = arith.constant 8 : index
    %c0_21 = arith.constant 0 : index
    %25 = vector.load %arg14[%c8_20, %c0_21] : memref<24x128xf32, #tpu.memory_space<vmem>>, vector<16x128xf32>
    tpu.vector_store %arg14[%c8_20, %c0_21], %24 {strides = array<i32>} : memref<24x128xf32, #tpu.memory_space<vmem>>, vector<16x128xf32>,
    %c4 = arith.constant 4 : index
    %c0_22 = arith.constant 0 : index
    %26 = vector.load %arg14[%c4, %c0_22] : memref<24x128xf32, #tpu.memory_space<vmem>>, vector<16x128xf32>
    %c0_23 = arith.constant 0 : index
    %c0_24 = arith.constant 0 : index
    %c0_25 = arith.constant 0 : index
    %27 = vector.load %arg5[%c0_23, %c0_24, %c0_25] : memref<3x128x128xf32, #tpu.memory_space<vmem>>, vector<1x128x128xf32>
    %28 = vector.shape_cast %27 : vector<1x128x128xf32> to vector<128x128xf32>
    %cst_26 = arith.constant dense<0.000000e+00> : vector<16x128xf32>
    %29 = tpu.matmul %26, %28, %cst_26 {dimension_numbers = #tpu.dot_dimension_numbers<[1], [0], [0], [1], [0, 0, 1, 1], [], []>} : vector<16x128xf32>, vector<128x128xf32>, vector<16x128xf32> -> vector<16x128xf32>
    %c6_27 = arith.constant 6 : index
    %c0_28 = arith.constant 0 : index
    %30 = vector.load %arg14[%c6_27, %c0_28] : memref<24x128xf32, #tpu.memory_space<vmem>>, vector<16x128xf32>
    %c1_29 = arith.constant 1 : index
    %c0_30 = arith.constant 0 : index
    %c0_31 = arith.constant 0 : index
    %31 = vector.load %arg5[%c1_29, %c0_30, %c0_31] : memref<3x128x128xf32, #tpu.memory_space<vmem>>, vector<1x128x128xf32>
    %32 = vector.shape_cast %31 : vector<1x128x128xf32> to vector<128x128xf32>
    %cst_32 = arith.constant dense<0.000000e+00> : vector<16x128xf32>
    %33 = tpu.matmul %30, %32, %cst_32 {dimension_numbers = #tpu.dot_dimension_numbers<[1], [0], [0], [1], [0, 0, 1, 1], [], []>} : vector<16x128xf32>, vector<128x128xf32>, vector<16x128xf32> -> vector<16x128xf32>
    %34 = arith.addf %29, %33 : vector<16x128xf32>
    %c8_33 = arith.constant 8 : index
    %c0_34 = arith.constant 0 : index
    %35 = vector.load %arg14[%c8_33, %c0_34] : memref<24x128xf32, #tpu.memory_space<vmem>>, vector<16x128xf32>
    %c2_35 = arith.constant 2 : index
    %c0_36 = arith.constant 0 : index
    %c0_37 = arith.constant 0 : index
    %36 = vector.load %arg5[%c2_35, %c0_36, %c0_37] : memref<3x128x128xf32, #tpu.memory_space<vmem>>, vector<1x128x128xf32>
    %37 = vector.shape_cast %36 : vector<1x128x128xf32> to vector<128x128xf32>
    %cst_38 = arith.constant dense<0.000000e+00> : vector<16x128xf32>
    %38 = tpu.matmul %35, %37, %cst_38 {dimension_numbers = #tpu.dot_dimension_numbers<[1], [0], [0], [1], [0, 0, 1, 1], [], []>} : vector<16x128xf32>, vector<128x128xf32>, vector<16x128xf32> -> vector<16x128xf32>
    %39 = arith.addf %34, %38 : vector<16x128xf32>
    %c0_39 = arith.constant 0 : index
    %c0_40 = arith.constant 0 : index
    %40 = vector.load %arg6[%c0_39, %c0_40] : memref<1x128xf32, #tpu.memory_space<vmem>>, vector<1x128xf32>
    %41 = vector.broadcast %40 : vector<1x128xf32> to vector<16x128xf32>
    %42 = arith.addf %39, %41 : vector<16x128xf32>
    %c0_41 = arith.constant 0 : index
    %c0_42 = arith.constant 0 : index
    %43 = vector.load %arg7[%c0_41, %c0_42] : memref<128x128xf32, #tpu.memory_space<vmem>>, vector<128x128xf32>
    %cst_43 = arith.constant dense<0.000000e+00> : vector<16x128xf32>
    %44 = tpu.matmul %4, %43, %cst_43 {dimension_numbers = #tpu.dot_dimension_numbers<[1], [0], [0], [1], [0, 0, 1, 1], [], []>} : vector<16x128xf32>, vector<128x128xf32>, vector<16x128xf32> -> vector<16x128xf32>
    %45 = arith.addf %42, %44 : vector<16x128xf32>
    %cst_44 = arith.constant 0.000000e+00 : f32
    %46 = vector.broadcast %cst_44 : f32 to vector<16x128xf32>
    %47 = arith.maximumf %45, %46 : vector<16x128xf32>
    %c16 = arith.constant 16 : index
    %c0_45 = arith.constant 0 : index
    %48 = vector.load %arg13[%c16, %c0_45] : memref<24x128xf32, #tpu.memory_space<vmem>>, vector<8x128xf32>
    %c0_46 = arith.constant 0 : index
    %c0_47 = arith.constant 0 : index
    %49 = vector.load %arg13[%c0_46, %c0_47] : memref<24x128xf32, #tpu.memory_space<vmem>>, vector<8x128xf32>
    tpu.vector_store %arg13[%c0_46, %c0_47], %48 {strides = array<i32>} : memref<24x128xf32, #tpu.memory_space<vmem>>, vector<8x128xf32>,
    %c16_48 = arith.constant 16 : index
    %c0_49 = arith.constant 0 : index
    %50 = vector.load %arg14[%c16_48, %c0_49] : memref<24x128xf32, #tpu.memory_space<vmem>>, vector<8x128xf32>
    %c0_50 = arith.constant 0 : index
    %c0_51 = arith.constant 0 : index
    %51 = vector.load %arg14[%c0_50, %c0_51] : memref<24x128xf32, #tpu.memory_space<vmem>>, vector<8x128xf32>
    tpu.vector_store %arg14[%c0_50, %c0_51], %50 {strides = array<i32>} : memref<24x128xf32, #tpu.memory_space<vmem>>, vector<8x128xf32>,
    %c16_52 = arith.constant 16 : index
    %c0_53 = arith.constant 0 : index
    %52 = vector.load %arg15[%c16_52, %c0_53] : memref<32x128xf32, #tpu.memory_space<vmem>>, vector<16x128xf32>
    tpu.vector_store %arg15[%c16_52, %c0_53], %47 {strides = array<i32>} : memref<32x128xf32, #tpu.memory_space<vmem>>, vector<16x128xf32>,
    %c6_54 = arith.constant 6 : index
    %c0_55 = arith.constant 0 : index
    %53 = vector.load %arg15[%c6_54, %c0_55] : memref<32x128xf32, #tpu.memory_space<vmem>>, vector<16x128xf32>
    %c0_56 = arith.constant 0 : index
    %c0_57 = arith.constant 0 : index
    %c0_58 = arith.constant 0 : index
    %54 = vector.load %arg8[%c0_56, %c0_57, %c0_58] : memref<3x128x128xf32, #tpu.memory_space<vmem>>, vector<1x128x128xf32>
    %55 = vector.shape_cast %54 : vector<1x128x128xf32> to vector<128x128xf32>
    %cst_59 = arith.constant dense<0.000000e+00> : vector<16x128xf32>
    %56 = tpu.matmul %53, %55, %cst_59 {dimension_numbers = #tpu.dot_dimension_numbers<[1], [0], [0], [1], [0, 0, 1, 1], [], []>} : vector<16x128xf32>, vector<128x128xf32>, vector<16x128xf32> -> vector<16x128xf32>
    %c11 = arith.constant 11 : index
    %c0_60 = arith.constant 0 : index
    %57 = vector.load %arg15[%c11, %c0_60] : memref<32x128xf32, #tpu.memory_space<vmem>>, vector<16x128xf32>
    %c1_61 = arith.constant 1 : index
    %c0_62 = arith.constant 0 : index
    %c0_63 = arith.constant 0 : index
    %58 = vector.load %arg8[%c1_61, %c0_62, %c0_63] : memref<3x128x128xf32, #tpu.memory_space<vmem>>, vector<1x128x128xf32>
    %59 = vector.shape_cast %58 : vector<1x128x128xf32> to vector<128x128xf32>
    %cst_64 = arith.constant dense<0.000000e+00> : vector<16x128xf32>
    %60 = tpu.matmul %57, %59, %cst_64 {dimension_numbers = #tpu.dot_dimension_numbers<[1], [0], [0], [1], [0, 0, 1, 1], [], []>} : vector<16x128xf32>, vector<128x128xf32>, vector<16x128xf32> -> vector<16x128xf32>
    %61 = arith.addf %56, %60 : vector<16x128xf32>
    %c16_65 = arith.constant 16 : index
    %c0_66 = arith.constant 0 : index
    %62 = vector.load %arg15[%c16_65, %c0_66] : memref<32x128xf32, #tpu.memory_space<vmem>>, vector<16x128xf32>
    %c2_67 = arith.constant 2 : index
    %c0_68 = arith.constant 0 : index
    %c0_69 = arith.constant 0 : index
    %63 = vector.load %arg8[%c2_67, %c0_68, %c0_69] : memref<3x128x128xf32, #tpu.memory_space<vmem>>, vector<1x128x128xf32>
    %64 = vector.shape_cast %63 : vector<1x128x128xf32> to vector<128x128xf32>
    %cst_70 = arith.constant dense<0.000000e+00> : vector<16x128xf32>
    %65 = tpu.matmul %62, %64, %cst_70 {dimension_numbers = #tpu.dot_dimension_numbers<[1], [0], [0], [1], [0, 0, 1, 1], [], []>} : vector<16x128xf32>, vector<128x128xf32>, vector<16x128xf32> -> vector<16x128xf32>
    %66 = arith.addf %61, %65 : vector<16x128xf32>
    %c0_71 = arith.constant 0 : index
    %c0_72 = arith.constant 0 : index
    %67 = vector.load %arg9[%c0_71, %c0_72] : memref<1x128xf32, #tpu.memory_space<vmem>>, vector<1x128xf32>
    %68 = vector.broadcast %67 : vector<1x128xf32> to vector<16x128xf32>
    %69 = arith.addf %66, %68 : vector<16x128xf32>
    %cst_73 = arith.constant 0.000000e+00 : f32
    %70 = vector.broadcast %cst_73 : f32 to vector<16x128xf32>
    %71 = arith.maximumf %69, %70 : vector<16x128xf32>
    %c24 = arith.constant 24 : index
    %c0_74 = arith.constant 0 : index
    %72 = vector.load %arg16[%c24, %c0_74] : memref<40x128xf32, #tpu.memory_space<vmem>>, vector<16x128xf32>
    tpu.vector_store %arg16[%c24, %c0_74], %71 {strides = array<i32>} : memref<40x128xf32, #tpu.memory_space<vmem>>, vector<16x128xf32>,
    %c6_75 = arith.constant 6 : index
    %c0_76 = arith.constant 0 : index
    %73 = vector.load %arg16[%c6_75, %c0_76] : memref<40x128xf32, #tpu.memory_space<vmem>>, vector<16x128xf32>
    %c0_77 = arith.constant 0 : index
    %c0_78 = arith.constant 0 : index
    %c0_79 = arith.constant 0 : index
    %74 = vector.load %arg10[%c0_77, %c0_78, %c0_79] : memref<3x128x128xf32, #tpu.memory_space<vmem>>, vector<1x128x128xf32>
    %75 = vector.shape_cast %74 : vector<1x128x128xf32> to vector<128x128xf32>
    %cst_80 = arith.constant dense<0.000000e+00> : vector<16x128xf32>
    %76 = tpu.matmul %73, %75, %cst_80 {dimension_numbers = #tpu.dot_dimension_numbers<[1], [0], [0], [1], [0, 0, 1, 1], [], []>} : vector<16x128xf32>, vector<128x128xf32>, vector<16x128xf32> -> vector<16x128xf32>
    %c15 = arith.constant 15 : index
    %c0_81 = arith.constant 0 : index
    %77 = vector.load %arg16[%c15, %c0_81] : memref<40x128xf32, #tpu.memory_space<vmem>>, vector<16x128xf32>
    %c1_82 = arith.constant 1 : index
    %c0_83 = arith.constant 0 : index
    %c0_84 = arith.constant 0 : index
    %78 = vector.load %arg10[%c1_82, %c0_83, %c0_84] : memref<3x128x128xf32, #tpu.memory_space<vmem>>, vector<1x128x128xf32>
    %79 = vector.shape_cast %78 : vector<1x128x128xf32> to vector<128x128xf32>
    %cst_85 = arith.constant dense<0.000000e+00> : vector<16x128xf32>
    %80 = tpu.matmul %77, %79, %cst_85 {dimension_numbers = #tpu.dot_dimension_numbers<[1], [0], [0], [1], [0, 0, 1, 1], [], []>} : vector<16x128xf32>, vector<128x128xf32>, vector<16x128xf32> -> vector<16x128xf32>
    %81 = arith.addf %76, %80 : vector<16x128xf32>
    %c24_86 = arith.constant 24 : index
    %c0_87 = arith.constant 0 : index
    %82 = vector.load %arg16[%c24_86, %c0_87] : memref<40x128xf32, #tpu.memory_space<vmem>>, vector<16x128xf32>
    %c2_88 = arith.constant 2 : index
    %c0_89 = arith.constant 0 : index
    %c0_90 = arith.constant 0 : index
    %83 = vector.load %arg10[%c2_88, %c0_89, %c0_90] : memref<3x128x128xf32, #tpu.memory_space<vmem>>, vector<1x128x128xf32>
    %84 = vector.shape_cast %83 : vector<1x128x128xf32> to vector<128x128xf32>
    %cst_91 = arith.constant dense<0.000000e+00> : vector<16x128xf32>
    %85 = tpu.matmul %82, %84, %cst_91 {dimension_numbers = #tpu.dot_dimension_numbers<[1], [0], [0], [1], [0, 0, 1, 1], [], []>} : vector<16x128xf32>, vector<128x128xf32>, vector<16x128xf32> -> vector<16x128xf32>
    %86 = arith.addf %81, %85 : vector<16x128xf32>
    %c0_92 = arith.constant 0 : index
    %c0_93 = arith.constant 0 : index
    %87 = vector.load %arg11[%c0_92, %c0_93] : memref<1x128xf32, #tpu.memory_space<vmem>>, vector<1x128xf32>
    %88 = vector.broadcast %87 : vector<1x128xf32> to vector<16x128xf32>
    %89 = arith.addf %86, %88 : vector<16x128xf32>
    %90 = arith.addf %89, %47 : vector<16x128xf32>
    %cst_94 = arith.constant 0.000000e+00 : f32
    %91 = vector.broadcast %cst_94 : f32 to vector<16x128xf32>
    %92 = arith.maximumf %90, %91 : vector<16x128xf32>
    %c16_95 = arith.constant 16 : index
    %c0_96 = arith.constant 0 : index
    %93 = vector.load %arg15[%c16_95, %c0_96] : memref<32x128xf32, #tpu.memory_space<vmem>>, vector<16x128xf32>
    %c0_97 = arith.constant 0 : index
    %c0_98 = arith.constant 0 : index
    %94 = vector.load %arg15[%c0_97, %c0_98] : memref<32x128xf32, #tpu.memory_space<vmem>>, vector<16x128xf32>
    tpu.vector_store %arg15[%c0_97, %c0_98], %93 {strides = array<i32>} : memref<32x128xf32, #tpu.memory_space<vmem>>, vector<16x128xf32>,
    %c16_99 = arith.constant 16 : index
    %c0_100 = arith.constant 0 : index
    %95 = vector.load %arg16[%c16_99, %c0_100] : memref<40x128xf32, #tpu.memory_space<vmem>>, vector<24x128xf32>
    %c0_101 = arith.constant 0 : index
    %c0_102 = arith.constant 0 : index
    %96 = vector.load %arg16[%c0_101, %c0_102] : memref<40x128xf32, #tpu.memory_space<vmem>>, vector<24x128xf32>
    tpu.vector_store %arg16[%c0_101, %c0_102], %95 {strides = array<i32>} : memref<40x128xf32, #tpu.memory_space<vmem>>, vector<24x128xf32>,
    %c0_103 = arith.constant 0 : index
    %c0_104 = arith.constant 0 : index
    %c0_105 = arith.constant 0 : index
    %97 = vector.load %arg12[%c0_103, %c0_104, %c0_105] : memref<1x16x128xf32, #tpu.memory_space<vmem>>, vector<1x16x128xf32>
    %98 = vector.shape_cast %97 : vector<1x16x128xf32> to vector<16x128xf32>
    %99 = vector.shape_cast %92 : vector<16x128xf32> to vector<1x16x128xf32>
    tpu.vector_store %arg12[%c0_103, %c0_104, %c0_105], %99 {strides = array<i32>} : memref<1x16x128xf32, #tpu.memory_space<vmem>>, vector<1x16x128xf32>,
    return
  }
  func.func @transform_0(%arg0: i32, %arg1: i32) -> (i32, i32, i32) {
    %c0_i32 = arith.constant 0 : i32
    %c0_i32_0 = arith.constant 0 : i32
    return %arg0, %arg1, %c0_i32 : i32, i32, i32
  }
  func.func @transform_1(%arg0: i32, %arg1: i32) -> (i32, i32, i32) {
    %c0_i32 = arith.constant 0 : i32
    %c0_i32_0 = arith.constant 0 : i32
    %c0_i32_1 = arith.constant 0 : i32
    %c0_i32_2 = arith.constant 0 : i32
    return %c0_i32, %c0_i32_0, %c0_i32_1 : i32, i32, i32
  }
  func.func @transform_2(%arg0: i32, %arg1: i32) -> (i32, i32) {
    %c0_i32 = arith.constant 0 : i32
    %c0_i32_0 = arith.constant 0 : i32
    %c0_i32_1 = arith.constant 0 : i32
    return %c0_i32, %c0_i32_0 : i32, i32
  }
  func.func @transform_3(%arg0: i32, %arg1: i32) -> (i32, i32, i32) {
    %c0_i32 = arith.constant 0 : i32
    %c0_i32_0 = arith.constant 0 : i32
    %c0_i32_1 = arith.constant 0 : i32
    %c0_i32_2 = arith.constant 0 : i32
    return %c0_i32, %c0_i32_0, %c0_i32_1 : i32, i32, i32
  }
  func.func @transform_4(%arg0: i32, %arg1: i32) -> (i32, i32) {
    %c0_i32 = arith.constant 0 : i32
    %c0_i32_0 = arith.constant 0 : i32
    %c0_i32_1 = arith.constant 0 : i32
    return %c0_i32, %c0_i32_0 : i32, i32
  }
  func.func @transform_5(%arg0: i32, %arg1: i32) -> (i32, i32) {
    %c0_i32 = arith.constant 0 : i32
    %c0_i32_0 = arith.constant 0 : i32
    %c0_i32_1 = arith.constant 0 : i32
    return %c0_i32, %c0_i32_0 : i32, i32
  }
  func.func @transform_6(%arg0: i32, %arg1: i32) -> (i32, i32, i32) {
    %c0_i32 = arith.constant 0 : i32
    %c0_i32_0 = arith.constant 0 : i32
    %c0_i32_1 = arith.constant 0 : i32
    %c0_i32_2 = arith.constant 0 : i32
    return %c0_i32, %c0_i32_0, %c0_i32_1 : i32, i32, i32
  }
  func.func @transform_7(%arg0: i32, %arg1: i32) -> (i32, i32) {
    %c0_i32 = arith.constant 0 : i32
    %c0_i32_0 = arith.constant 0 : i32
    %c0_i32_1 = arith.constant 0 : i32
    return %c0_i32, %c0_i32_0 : i32, i32
  }
  func.func @transform_8(%arg0: i32, %arg1: i32) -> (i32, i32, i32) {
    %c0_i32 = arith.constant 0 : i32
    %c0_i32_0 = arith.constant 0 : i32
    %c0_i32_1 = arith.constant 0 : i32
    %c0_i32_2 = arith.constant 0 : i32
    return %c0_i32, %c0_i32_0, %c0_i32_1 : i32, i32, i32
  }
  func.func @transform_9(%arg0: i32, %arg1: i32) -> (i32, i32) {
    %c0_i32 = arith.constant 0 : i32
    %c0_i32_0 = arith.constant 0 : i32
    %c0_i32_1 = arith.constant 0 : i32
    return %c0_i32, %c0_i32_0 : i32, i32
  }
  func.func @transform_10(%arg0: i32, %arg1: i32) -> (i32, i32, i32) {
    %c0_i32 = arith.constant 0 : i32
    %c0_i32_0 = arith.constant 0 : i32
    return %arg0, %arg1, %c0_i32 : i32, i32, i32
  }
}

</mosaic_0001>

<bundles_post_ra>
// kernel: tpu_custom_call.1
= control target key start
LH: loop header
LB: loop body
LE: loop exit
PB: predicated region body
PF: predicated region fallthrough
CT: control target
= control target key end

     0   :  { %s3992_s0 = inlined_call_operand.hbm [shape: f32[2,32,128], index: 0, kind: input, shape index: {}]   ;;  %s3993_s1 = inlined_call_operand.hbm [shape: f32[3,128,128], index: 1, kind: input, shape index: {}]   ;;  %s3994_s2 = inlined_call_operand.vmem [shape: f32[1,128], index: 2, kind: input, shape index: {}]   ;;  %s3995_s3 = inlined_call_operand.hbm [shape: f32[3,128,128], index: 3, kind: input, shape index: {}]   ;;  %s3996_s4 = inlined_call_operand.vmem [shape: f32[1,128], index: 4, kind: input, shape index: {}]   ;;  %s3997_s5 = inlined_call_operand.hbm [shape: f32[128,128], index: 5, kind: input, shape index: {}]   ;;  %s3998_s6 = inlined_call_operand.hbm [shape: f32[3,128,128], index: 6, kind: input, shape index: {}]   ;;  %s3999_s7 = inlined_call_operand.vmem [shape: f32[1,128], index: 7, kind: input, shape index: {}]   ;;  %s4000_s8 = inlined_call_operand.hbm [shape: f32[3,128,128], index: 8, kind: input, shape index: {}]   ;;  %s4001_s9 = inlined_call_operand.vmem [shape: f32[1,128], index: 9, kind: input, shape index: {}]   ;;  %s4002_s10 = inlined_call_operand.hbm [shape: f32[2,32,128], index: 10, kind: output, shape index: {}]  }
   0x1   :  { %4011 = sst [smem:[#allocation24_spill]] %s3993_s1 }
   0x2   :  { %4012 = sst [smem:[#allocation25_spill]] %s3994_s2 }
   0x3   :  { %4013 = sst [smem:[#allocation26_spill]] %s3995_s3 }
   0x4   :  { %4014 = sst [smem:[#allocation27_spill]] %s3996_s4 }
   0x5   :  { %4015 = sst [smem:[#allocation28_spill]] %s3997_s5 }
   0x6   :  { %4016 = sst [smem:[#allocation29_spill]] %s3998_s6 }
   0x7   :  { %4017 = sst [smem:[#allocation30_spill]] %s3999_s7 }
   0x8   :  { %4018 = sst [smem:[#allocation31_spill]] %s4001_s9 }
   0x9   :  { %4019 = sst [smem:[#allocation32_spill]] %s4002_s10 }
   0xa   :  { %15 = vsyncpa [#allocation7], 0 }
   0xb   :  { %17 = vsyncpa [#allocation7 + $0x1], 0 }
   0xc   :  { %18 = vsyncpa [#allocation10], 0 }
   0xd   :  { %19 = vsyncpa [#allocation13], 0 }
   0xe   :  { %20 = vsyncpa [#allocation16], 0 }
   0xf   :  { %21 = vsyncpa [#allocation8], 0 }
  0x10   :  { %23 = vsyncpa [#allocation8 + $0x1], 0  ;;  %s3573_s13 = smov 0   ;;  %s3575_s14 = smov 0  }
  0x11   :  { %s3577_s15 = smov 0   ;;  %s3579_s16 = smov 0  }
  0x12   :  { %s3581_s17 = smov 0   ;;  %s3583_s18 = smov 0  }
  0x13   :  { %s3585_s19 = smov 0   ;;  %s3587_s20 = smov 0  }
  0x14 LB: > { %4020 = sst [smem:[#allocation23_spill]] %s3492_s17  ;;  %s4003_s21 = sadd.s32 4294967295, %s3504_s20   ;;  %s3504_s20 = sphi %s3587_s20, %s29_s20   ;;  %s3500_s19 = sphi %s3585_s19, %s4054_s19   ;;  %s3496_s18 = sphi %s3583_s18, %s4053_s18   ;;  %s3492_s17 = sphi %s3581_s17, %s4052_s17   ;;  %s3488_s16 = sphi %s3579_s16, %s4051_s16   ;;  %s3484_s15 = sphi %s3577_s15, %s4050_s15   ;;  %s3480_s14 = sphi %s3575_s14, %s4049_s14   ;;  %s3476_s13 = sphi %s3573_s13, %s4048_s13  }
  0x15   : > { %p1935_p0 = scmp.ge.s32.totalorder %s3504_s20, 1  ;;  %p3617_p1 = scmp.eq.s32.totalorder %s4003_s21, 0 }
  0x16   : > { %p291_p2 = scmp.lt.s32.totalorder %s3504_s20, 5  ;;  %s3506_s24 = smov [#allocation9]  }
  0x17   : > { %s4021_s22 = scalar_select %p3617_p1, 1, 0 }
  0x18   : > { %p3622_p3 = pnand %p1935_p0, %p291_p2  ;;  %s303_s25 = sshll.u32 %s3506_s24, 4  ;;  %s3626_s25 = int_to_ptr.vmem [resolvable:$true] %s303_s25 }
  0x19   : > { %s3507_s27 = smov [#allocation12]   ;;  %s3508_s29 = smov [#allocation11]  }
  0x1a   : > { %s4022_s23 = scalar_select %p3622_p3, 1, 0 }
  0x1b   : > { %p3114_p4 = pneg %p3622_p3  ;;  %s335_s28 = sshll.u32 %s3507_s27, 4  ;;  %s3636_s28 = int_to_ptr.vmem [resolvable:$true] %s335_s28 }
  0x1c   : > { %s3638_s30 = sshll.u32 %s3508_s29, 4  ;;  %s4024_s1 = sld [smem:[#allocation24_spill]]  ;;  %s320_s30 = int_to_ptr.vmem [resolvable:$true] %s3638_s30 }
  0x1d   : > { %p3632_p5 = pnand %p3114_p4, %p3617_p1 }
  0x1f   : > { %p3648_p7 = pneg %p3632_p5 }
  0x22   : > { %s3224_s24 = scalar_lea.hbm %s4024_s1, 6144 }
  0x23   : > { %p3225_p6 = scmp.ne.s32.totalorder %s4024_s1, %s3224_s24  ;;  %p3231_p10 = scmp.lt.u32.totalorder %s3224_s24, %s4024_s1 }
  0x25   : > { %p3227_p8 = pnand %p3648_p7, %p3225_p6 }
  0x27   : > { %p3228_p9 = pneg %p3227_p8 }
  0x29   : > { %p3233_p11 = pnand %p3231_p10, %p3228_p9 }
  0x2b   : > { %3236 = shalt.err (!%p3233_p11)
}
  0x2c   : > { %s3237_s10 = scalar_lea.vmem %s3626_s25, 6144  ;;  %p3245_p2 = scmp.lt.s32.totalorder %s3626_s25, %s3626_s25 }
  0x2d   : > { %p3238_p12 = scmp.ne.s32.totalorder %s3626_s25, %s3237_s10  ;;  %p3246_p4 = scmp.lt.s32.totalorder %s3237_s10, %s3237_s10 }
  0x2f   : > { %p3240_p13 = pnand %p3238_p12, %p3648_p7  ;;  %p3247_p6 = por %p3246_p4, %p3245_p2 }
  0x31   : > { %p3241_p0 = pneg %p3240_p13 }
  0x33   : > { %p3248_p8 = pnand %p3247_p6, %p3241_p0 }
  0x35   : > { %3251 = shalt.err (!%p3248_p8)
}
  0x36   : > { %s4008_s21 = smov 128   ;;  %s4009_s11 = smov 8  }
  0x37   : > { %3117 = dma.hbm_to_vmem [thread:$0]  (!%p3632_p5), %s4024_s1, 6144, %s3626_s25, [#allocation10], %s4008_s21, %s4008_s21, %s4009_s11  }
  0x38   : > { %s4026_s5 = sld [smem:[#allocation28_spill]] }
  0x3e   : > { %s3252_s10 = scalar_lea.hbm %s4026_s5, 2048 }
  0x3f   : > { %p3253_p9 = scmp.ne.s32.totalorder %s4026_s5, %s3252_s10  ;;  %p3259_p12 = scmp.lt.u32.totalorder %s3252_s10, %s4026_s5 }
  0x41   : > { %p3255_p10 = pnand %p3253_p9, %p3648_p7 }
  0x43   : > { %p3256_p11 = pneg %p3255_p10 }
  0x45   : > { %p3261_p13 = pnand %p3259_p12, %p3256_p11 }
  0x47   : > { %3264 = shalt.err (!%p3261_p13)
}
  0x48   : > { %s3265_s25 = scalar_lea.vmem %s3636_s28, 2048  ;;  %p3273_p6 = scmp.lt.s32.totalorder %s3636_s28, %s3636_s28 }
  0x49   : > { %p3266_p0 = scmp.ne.s32.totalorder %s3636_s28, %s3265_s25  ;;  %p3274_p8 = scmp.lt.s32.totalorder %s3265_s25, %s3265_s25 }
  0x4b   : > { %p3268_p2 = pnand %p3266_p0, %p3648_p7  ;;  %p3275_p9 = por %p3274_p8, %p3273_p6 }
  0x4d   : > { %p3269_p4 = pneg %p3268_p2 }
  0x4f   : > { %p3276_p10 = pnand %p3275_p9, %p3269_p4 }
  0x51   : > { %3279 = shalt.err (!%p3276_p10)
}
  0x52   : > { %3123 = dma.hbm_to_vmem [thread:$0]  (!%p3632_p5), %s4026_s5, 2048, %s3636_s28, [#allocation13], %s4008_s21, %s4008_s21, %s4009_s11  }
  0x53   : > { %s4027_s3 = sld [smem:[#allocation26_spill]] }
  0x59   : > { %s3280_s12 = scalar_lea.hbm %s4027_s3, 6144 }
  0x5a   : > { %p3281_p11 = scmp.ne.s32.totalorder %s4027_s3, %s3280_s12  ;;  %p3287_p0 = scmp.lt.u32.totalorder %s3280_s12, %s4027_s3 }
  0x5c   : > { %p3283_p12 = pnand %p3281_p11, %p3648_p7 }
  0x5e   : > { %p3284_p13 = pneg %p3283_p12 }
  0x60   : > { %p3289_p2 = pnand %p3287_p0, %p3284_p13 }
  0x62   : > { %3292 = shalt.err (!%p3289_p2)
}
  0x63   : > { %s3293_s25 = scalar_lea.vmem %s320_s30, 6144  ;;  %p3301_p9 = scmp.lt.s32.totalorder %s320_s30, %s320_s30 }
  0x64   : > { %p3294_p4 = scmp.ne.s32.totalorder %s320_s30, %s3293_s25  ;;  %p3302_p10 = scmp.lt.s32.totalorder %s3293_s25, %s3293_s25 }
  0x66   : > { %p3296_p6 = pnand %p3294_p4, %p3648_p7  ;;  %p3303_p3 = por %p3302_p10, %p3301_p9 }
  0x68   : > { %p3297_p8 = pneg %p3296_p6 }
  0x6a   : > { %p3304_p1 = pnand %p3303_p3, %p3297_p8 }
  0x6c   : > { %3307 = shalt.err (!%p3304_p1)
}
  0x6d   : > { %3120 = dma.hbm_to_vmem [thread:$0]  (!%p3632_p5), %s4027_s3, 6144, %s320_s30, [#allocation10], %s4008_s21, %s4008_s21, %s4009_s11  }
  0x6e   : > { %s3511_s4 = smov [#allocation14]   ;;  %s3512_s17 = smov [#allocation15]  }
  0x6f   : > { %s348_s7 = sshll.u32 %s3511_s4, 4  ;;  %s364_s12 = sshll.u32 %s3512_s17, 4  ;;  %s349_s7 = int_to_ptr.vmem [resolvable:$true] %s348_s7  ;;  %s365_s12 = int_to_ptr.vmem [resolvable:$true] %s364_s12 }
  0x70   : > { %s4028_s6 = sld [smem:[#allocation29_spill]] }
  0x76   : > { %s3308_s29 = scalar_lea.hbm %s4028_s6, 6144 }
  0x77   : > { %p3309_p1 = scmp.ne.s32.totalorder %s4028_s6, %s3308_s29  ;;  %p3315_p12 = scmp.lt.u32.totalorder %s3308_s29, %s4028_s6 }
  0x79   : > { %p3311_p3 = pnand %p3309_p1, %p3648_p7 }
  0x7b   : > { %p3312_p11 = pneg %p3311_p3 }
  0x7d   : > { %p3317_p13 = pnand %p3315_p12, %p3312_p11 }
  0x7f   : > { %3320 = shalt.err (!%p3317_p13)
}
  0x80   : > { %s3321_s30 = scalar_lea.vmem %s349_s7, 6144  ;;  %p3329_p6 = scmp.lt.s32.totalorder %s349_s7, %s349_s7 }
  0x81   : > { %p3322_p0 = scmp.ne.s32.totalorder %s349_s7, %s3321_s30  ;;  %p3330_p8 = scmp.lt.s32.totalorder %s3321_s30, %s3321_s30 }
  0x83   : > { %p3324_p2 = pnand %p3322_p0, %p3648_p7  ;;  %p3331_p9 = por %p3330_p8, %p3329_p6 }
  0x85   : > { %p3325_p4 = pneg %p3324_p2 }
  0x87   : > { %p3332_p10 = pnand %p3331_p9, %p3325_p4 }
  0x89   : > { %3335 = shalt.err (!%p3332_p10)
}
  0x8a   : > { %3126 = dma.hbm_to_vmem [thread:$0]  (!%p3632_p5), %s4028_s6, 6144, %s349_s7, [#allocation13], %s4008_s21, %s4008_s21, %s4009_s11  }
  0x8b   : > { %s3336_s24 = scalar_lea.hbm %s4000_s8, 6144 }
  0x8c   : > { %p3337_p1 = scmp.ne.s32.totalorder %s4000_s8, %s3336_s24  ;;  %p3343_p12 = scmp.lt.u32.totalorder %s3336_s24, %s4000_s8 }
  0x8e   : > { %p3339_p3 = pnand %p3337_p1, %p3648_p7 }
  0x90   : > { %p3340_p11 = pneg %p3339_p3 }
  0x92   : > { %p3345_p13 = pnand %p3343_p12, %p3340_p11 }
  0x94   : > { %3348 = shalt.err (!%p3345_p13)
}
  0x95   : > { %s3349_s28 = scalar_lea.vmem %s365_s12, 6144  ;;  %p3357_p6 = scmp.lt.s32.totalorder %s365_s12, %s365_s12 }
  0x96   : > { %p3350_p0 = scmp.ne.s32.totalorder %s365_s12, %s3349_s28  ;;  %p3358_p8 = scmp.lt.s32.totalorder %s3349_s28, %s3349_s28 }
  0x98   : > { %p3352_p2 = pnand %p3350_p0, %p3648_p7  ;;  %p3359_p9 = por %p3358_p8, %p3357_p6 }
  0x9a   : > { %p3353_p4 = pneg %p3352_p2 }
  0x9c   : > { %p3360_p10 = pnand %p3359_p9, %p3353_p4 }
  0x9e   : > { %3363 = shalt.err (!%p3360_p10)
}
  0x9f   : > { %3129 = dma.hbm_to_vmem [thread:$0]  (!%p3632_p5), %s4000_s8, 6144, %s365_s12, [#allocation16], %s4008_s21, %s4008_s21, %s4009_s11  }
  0xa0   : > { %s1934_s9 = sadd.s32 4294967294, %s3504_s20   ;;  %s38_s26 = sadd.s32 1, %s3496_s18 }
  0xa1   : > { %s41_s1 = sadd.s32 1, %s3500_s19  ;;  %p39_p7 = scmp.ge.s32.totalorder %s38_s26, 2 }
  0xa2   : > { %s50_s2 = sadd.s32 1, %s3484_s15  ;;  %p57_p1 = scmp.ne.s32.totalorder %s3484_s15, %s3480_s14 }
  0xa3   : > { %p58_p3 = scmp.eq.s32.totalorder %s3504_s20, 0  ;;  %s4056_s26 = smov (%p39_p7, %s38_s26), 0 }
  0xa4   : > { %s4058_s1 = smov (!%p39_p7, %s41_s1), %s3500_s19  ;;  %s46_s4 = ssub.s32 %s3496_s18, %s4056_s26 }
  0xa5   : > { %p3774_p11 = por %p58_p3, %p57_p1  ;;  %p43_p5 = scmp.ge.s32.totalorder %s4058_s1, 2 }
  0xa6   : > { %p63_p12 = scmp.ne.s32.totalorder %s3480_s14, %s3476_s13  ;;  %s4030_s12 = sadd.s32 4294967295, %s3504_s20  }
  0xa7   : > { %p278_p13 = scmp.eq.s32.totalorder %s4030_s12, 3  ;;  %p284_p0 = scmp.eq.s32.totalorder %s1934_s9, 3 }
  0xa8   : > { %s4060_s1 = smov (%p43_p5, %s4058_s1), 0  ;;  %p4031_p2 = scmp.ne.s32.totalorder %s4021_s22, 0 }
  0xa9   : > { %p3790_p6 = por %p278_p13, %p57_p1  ;;  %s45_s29 = ssub.s32 %s3500_s19, %s4060_s1 }
  0xaa   : > { %p3786_p4 = por %p4031_p2, %p63_p12  ;;  %p3796_p8 = por %p284_p0, %p63_p12 }
  0xab   : > { %s4033_s27 = scalar_select %p3790_p6, 1, 0 }
  0xac   : > { %s4034_s10 = scalar_select %p3796_p8, 1, 0 }
  0xad   : > { %s47_s25 = sor.u32 %s46_s4, %s45_s29  ;;  %p3143_p9 = scmp.lt.s32.totalorder %s3504_s20, 4 }
  0xae   : > { %p48_p10 = scmp.eq.s32.totalorder %s47_s25, 0  ;;  %s381_s28 = sand.u32 1, %s3484_s15  }
  0xaf   : > { %s1942_s7 = sshll.u32 %s381_s28, 4  ;;  %s1943_s9 = sshll.u32 %s3496_s18, 1 }
  0xb0   : > { %s3803_s30 = scalar_select %p48_p10, %s3484_s15, %s50_s2  }
  0xb1   : > { %s1944_s12 = sshll.u32 %s3500_s19, 2  ;;  %s385_s21 = scalar_lea.vmem [#allocation6], %s1942_s7 }
  0xb2   : > { %s394_s11 = sshll.u32 %s385_s21, 4  ;;  %s391_s3 = sadd.s32 %s1944_s12, %s1943_s9  ;;  %s3807_s11 = int_to_ptr.vmem [resolvable:$true] %s394_s11 }
  0xb3   : > { %s1945_s5 = sshll.u32 %s391_s3, 7  ;;  %p3811_p7 = pnand %p3143_p9, %p3774_p11 }
  0xb4   : > { %s3818_s2 = scalar_lea.hbm %s3992_s0, %s1945_s5  ;;  %s3820_s21 = scalar_lea.sflag [#allocation7], %s381_s28 }
  0xb5   : > { %s3364_s25 = scalar_lea.hbm %s3818_s2, 256  ;;  %p3366_p3 = pneg %p3811_p7 }
  0xb6   : > { %p3365_p1 = scmp.ne.s32.totalorder %s3818_s2, %s3364_s25  ;;  %s3369_s7 = scalar_lea.hbm %s3992_s0, 1024 }
  0xb7   : > { %p3370_p12 = scmp.lt.u32.totalorder %s3818_s2, %s3992_s0  ;;  %p3371_p13 = scmp.lt.u32.totalorder %s3369_s7, %s3364_s25 }
  0xb8   : > { %p3367_p11 = pnand %p3366_p3, %p3365_p1  ;;  %p3373_p2 = scmp.lt.u32.totalorder %s3364_s25, %s3818_s2 }
  0xb9   : > { %p3372_p0 = por %p3371_p13, %p3370_p12 }
  0xba   : > { %p3368_p5 = pneg %p3367_p11 }
  0xbb   : > { %p3374_p9 = por %p3373_p2, %p3372_p0 }
  0xbd   : > { %p3375_p10 = pnand %p3374_p9, %p3368_p5 }
  0xbf   : > { %3378 = shalt.err (!%p3375_p10)
}
  0xc0   : > { %s3379_s28 = scalar_lea.vmem %s3807_s11, 256  ;;  %s3513_s12 = smov [#allocation6]  }
  0xc1   : > { %p3380_p1 = scmp.ne.s32.totalorder %s3807_s11, %s3379_s28  ;;  %s3384_s4 = sshll.u32 %s3513_s12, 4  ;;  %s3385_s4 = int_to_ptr.vmem [resolvable:$false] %s3384_s4 }
  0xc2   : > { %s3386_s29 = scalar_lea.vmem %s3385_s4, 512  ;;  %p3387_p6 = scmp.lt.s32.totalorder %s3807_s11, %s3385_s4 }
  0xc3   : > { %p3382_p11 = pnand %p3380_p1, %p3366_p3  ;;  %p3388_p12 = scmp.lt.s32.totalorder %s3386_s29, %s3379_s28 }
  0xc5   : > { %p3383_p8 = pneg %p3382_p11  ;;  %p3389_p13 = por %p3388_p12, %p3387_p6 }
  0xc7   : > { %p3390_p0 = pnand %p3389_p13, %p3383_p8 }
  0xc9   : > { %3393 = shalt.err (!%p3390_p0)
}
  0xca   : > { %s4036_s25 = smov 8   ;;  %s4037_s3 = smov 128  }
  0xcb   : > { %3133 = dma.hbm_to_vmem [thread:$0]  (!%p3811_p7), %s3818_s2, 256, %s3807_s11, %s3820_s21, %s4037_s3, %s4037_s3, %s4036_s25  }
  0xcc   : > { %p4038_p3 = scmp.ne.s32.totalorder %s4022_s23, 0 }
  0xcd   : > { %s3854_s17 = sand.u32 (!%p4038_p3), 1, %s3480_s14  }
  0xce   : > { %406 = sbr.rel (%p4038_p3) target bundleno = 1464 (0x5b8), region = 60  ;;  %s1947_s7 = sshll.u32 (!%p4038_p3), %s3854_s17, 4 }
  0xcf   : > { %s409_s5 = scalar_lea.sflag (!%p4038_p3), [#allocation7], %s3854_s17  ;;  %s3858_s9 = scalar_lea.vmem (!%p4038_p3), [#allocation6], %s1947_s7 }
  0xd5   : > { %3455 = dma.done.wait (%p3786_p4), %s409_s5, 256  }
  0xd6   : > { %3457 = vsyncadd (%p3786_p4), %s409_s5, 4294967040  ;;  %p4039_p6 = scmp.ne.s32.totalorder %s4021_s22, 0 }
  0xd8   : > { %3459 = dma.done.wait (%p4039_p6), [#allocation10], 12288  }
  0xd9   : > { %3461 = vsyncadd (%p4039_p6), [#allocation10], 4294955008 }
  0xda   : > { %3463 = dma.done.wait (%p4039_p6), [#allocation13], 8192  }
  0xdb   : > { %3465 = vsyncadd (%p4039_p6), [#allocation13], 4294959104 }
  0xdc   : > { %3467 = dma.done.wait (%p4039_p6), [#allocation16], 6144  }
  0xdd   : > { %3469 = vsyncadd (%p4039_p6), [#allocation16], 4294961152  ;;  %s3876_s6 = scalar_lea.vmem [#allocation17], %s1947_s7  ;;  %p1954_p4 = scmp.ne.s32.totalorder %s3488_s16, 0 }
  0xde   : > { %v3514_v0 = vmov (!%p1954_p4), 0.0  }
  0xdf   : > { %474 = sbr.rel (%p1954_p4) target bundleno = 230 (0xe6), region = 88  ;;  %475 = vst [vmem:[#allocation2] sm:$0xff] (!%p1954_p4), %v3514_v0  ;;  %476 = vst [vmem:[#allocation3] sm:$0xff] (!%p1954_p4), %v3514_v0 }
  0xe0   : > { %477 = vst [vmem:[#allocation4] sm:$0xff] (!%p1954_p4), %v3514_v0  ;;  %478 = vst [vmem:[#allocation4 + $0x8] sm:$0xff] (!%p1954_p4), %v3514_v0 }
  0xe1   : > { %479 = vst [vmem:[#allocation5] sm:$0xff] (!%p1954_p4), %v3514_v0  ;;  %480 = vst [vmem:[#allocation5 + $0x8] sm:$0xff] (!%p1954_p4), %v3514_v0 }
  0xe2   : > { %481 = vst [vmem:[#allocation5 + $0x10] sm:$0xff] (!%p1954_p4), %v3514_v0 }
  0xe6 PF: > { %v507_v1 = vld [vmem:[#allocation9 + $0x80] sm:$0xff]  ;;  %v508_v2 = vld [vmem:[#allocation9 + $0x88] sm:$0xff]  ;;  %v509_v3 = vld [vmem:[#allocation9 + $0x90] sm:$0xff]  ;;  %s4040_s11 = sld [smem:[#allocation25_spill]]  ;;  %s4041_s21 = sld [smem:[#allocation27_spill]] }
  0xe7   : > { %v2654_v4 = vpack.c.bf16 %v508_v2, %v507_v1  ;;  %v510_v5 = vld [vmem:[#allocation9 + $0x98] sm:$0xff]  ;;  %v511_v7 = vld [vmem:[#allocation9 + $0xa0] sm:$0xff]  ;;  %v512_v8 = vld [vmem:[#allocation9 + $0xa8] sm:$0xff]  ;;  %s4042_s4 = sld [smem:[#allocation30_spill]]  ;;  %s4043_s29 = sld [smem:[#allocation23_spill]] }
  0xe8   : > { %v2658_v6 = vpack.c.bf16 %v510_v5, %v509_v3  ;;  %v2662_v9 = vpack.c.bf16 %v512_v8, %v511_v7  ;;  %v3880_v10 = vld [vmem:[%s3858_s9] sm:$0xff]  ;;  %v514_v12 = vld [vmem:[#allocation9 + $0xb8] sm:$0xff]  ;;  %v516_v16 = vld [vmem:[#allocation9 + $0xc8] sm:$0xff]  ;;  %s1960_s25 = sshll.u32 %s3488_s16, 1  ;;  %s4045_s2 = sld [smem:[#allocation32_spill]] }
  0xe9   : > { %2655 = vmatprep.subr.bf16.mxu0 %v2654_v4  ;;  %v513_v11 = vld [vmem:[#allocation9 + $0xb0] sm:$0xff]  ;;  %484 = vst [vmem:[#allocation2 + $0x8] sm:$0xff] %v3880_v10  ;;  %v3884_v13 = vld [vmem:[%s3858_s9 + $0x8] sm:$0xff]  ;;  %v515_v15 = vld [vmem:[#allocation9 + $0xc0] sm:$0xff]  ;;  %s4044_s9 = sld [smem:[#allocation31_spill]]  ;;  %s1780_s28 = scalar_lea.sflag [#allocation8], %s3854_s17 }
  0xea   : > { %2657 = vmatpush3.bf16.msra.mxu0 %v2654_v4  ;;  %485 = vst [vmem:[#allocation2 + $0x10] sm:$0xff] %v3884_v13  ;;  %v2666_v14 = vpack.c.bf16 %v514_v12, %v513_v11  ;;  %v2670_v17 = vpack.c.bf16 %v516_v16, %v515_v15  ;;  %v517_v20 = vld [vmem:[#allocation9 + $0xd0] sm:$0xff]  ;;  %v518_v21 = vld [vmem:[#allocation9 + $0xd8] sm:$0xff]  ;;  %v519_v23 = vld [vmem:[#allocation9 + $0xe0] sm:$0xff]  ;;  %p4046_p7 = scmp.ne.s32.totalorder %s4033_s27, 0 }
  0xeb   : > { %2659 = vmatprep.subr.bf16.mxu0 %v2658_v6  ;;  %v2674_v22 = vpack.c.bf16 %v518_v21, %v517_v20  ;;  %v520_v24 = vld [vmem:[#allocation9 + $0xe8] sm:$0xff]  ;;  %v803_v25 = vld [vmem:[#allocation11 + $0x80] sm:$0xff]  ;;  %v805_v27 = vld [vmem:[#allocation11 + $0x90] sm:$0xff] }
  0xec   : > { %v804_v26 = vld [vmem:[#allocation11 + $0x88] sm:$0xff]  ;;  %v806_v29 = vld [vmem:[#allocation11 + $0x98] sm:$0xff]  ;;  %v807_v31 = vld [vmem:[#allocation11 + $0xa0] sm:$0xff]  ;;  %v2678_v33 = vpack.c.bf16 %v520_v24, %v519_v23 }
  0xed   : > { %v2750_v28 = vpack.c.bf16 %v804_v26, %v803_v25  ;;  %v2754_v30 = vpack.c.bf16 %v806_v29, %v805_v27  ;;  %v808_v32 = vld [vmem:[#allocation11 + $0xa8] sm:$0xff]  ;;  %v521_v34 = vld [vmem:[#allocation9 + $0xf0] sm:$0xff]  ;;  %v522_v35 = vld [vmem:[#allocation9 + $0xf8] sm:$0xff]  ;;  %s1961_s3 = sshll.u32 %s4043_s29, 2 }
  0xee   : > { %2661 = vmatpush3.bf16.msra.mxu0 %v2658_v6  ;;  %v2758_v36 = vpack.c.bf16 %v808_v32, %v807_v31  ;;  %v809_v37 = vld [vmem:[#allocation11 + $0xb0] sm:$0xff]  ;;  %v810_v38 = vld [vmem:[#allocation11 + $0xb8] sm:$0xff]  ;;  %v2682_v39 = vpack.c.bf16 %v522_v35, %v521_v34  ;;  %v488_v40 = vld [vmem:[#allocation9] sm:$0xff]  ;;  %s1792_s22 = sadd.s32 %s1961_s3, %s1960_s25 }
  0xef   : > { %2663 = vmatprep.subr.bf16.mxu0 %v2662_v9  ;;  %2751 = vmatprep.subr.bf16.mxu1 %v2750_v28  ;;  %v489_v41 = vld [vmem:[#allocation9 + $0x8] sm:$0xff]  ;;  %v2762_v42 = vpack.c.bf16 %v810_v38, %v809_v37  ;;  %v811_v43 = vld [vmem:[#allocation11 + $0xc0] sm:$0xff]  ;;  %v490_v46 = vld [vmem:[#allocation9 + $0x10] sm:$0xff]  ;;  %s1962_s23 = sshll.u32 %s1792_s22, 7 }
  0xf0   : > { %v504_v18 = vld [vmem:[#allocation2 + $0x7] sm:$0xff]  ;;  %2753 = vmatpush3.bf16.msra.mxu1 %v2750_v28  ;;  %v2686_v45 = vpack.c.bf16 %v489_v41, %v488_v40  ;;  %v491_v47 = vld [vmem:[#allocation9 + $0x18] sm:$0xff]  ;;  %v492_v51 = vld [vmem:[#allocation9 + $0x20] sm:$0xff] }
  0xf1   : > { %v486_v19 = vld [vmem:[#allocation2 + $0x6] sm:$0xff]  ;;  %2231 = vmatprep.mubr.f32.mxu0 %v504_v18  ;;  %2755 = vmatprep.subr.bf16.mxu1 %v2754_v30  ;;  %v505_v49 = vld [vmem:[#allocation2 + $0xf] sm:$0xff]  ;;  %v2690_v50 = vpack.c.bf16 %v491_v47, %v490_v46  ;;  %v496_v57 = vld [vmem:[#allocation9 + $0x40] sm:$0xff] }
  0xf2   : > { %2665 = vmatpush3.bf16.msra.mxu0 %v2662_v9  ;;  %1170 = vst [vmem:[#allocation2] sm:$0xff] %v3884_v13  ;;  %v812_v44 = vld [vmem:[#allocation11 + $0xc8] sm:$0xff]  ;;  %v494_v54 = vld [vmem:[#allocation9 + $0x30] sm:$0xff]  ;;  %v495_v55 = vld [vmem:[#allocation9 + $0x38] sm:$0xff] }
  0xf3   : > { %2667 = vmatprep.subr.bf16.mxu0 %v2666_v14  ;;  %v2766_v48 = vpack.c.bf16 %v812_v44, %v811_v43  ;;  %v493_v52 = vld [vmem:[#allocation9 + $0x28] sm:$0xff]  ;;  %v2698_v56 = vpack.c.bf16 %v495_v55, %v494_v54  ;;  %v498_v60 = vld [vmem:[#allocation9 + $0x50] sm:$0xff]  ;;  %v499_v61 = vld [vmem:[#allocation9 + $0x58] sm:$0xff] }
  0xf4   : > { %2757 = vmatpush3.bf16.msra.mxu1 %v2754_v30  ;;  %v2694_v53 = vpack.c.bf16 %v493_v52, %v492_v51  ;;  %v497_v58 = vld [vmem:[#allocation9 + $0x48] sm:$0xff]  ;;  %v2706_v62 = vpack.c.bf16 %v499_v61, %v498_v60  ;;  %v500_v63 = vld [vmem:[#allocation9 + $0x60] sm:$0xff]  ;;  %v502_v2 = vld [vmem:[#allocation9 + $0x70] sm:$0xff] }
  0xf5   : > { %2759 = vmatprep.subr.bf16.mxu1 %v2758_v36  ;;  %v2702_v59 = vpack.c.bf16 %v497_v58, %v496_v57  ;;  %v501_v0 = vld [vmem:[#allocation9 + $0x68] sm:$0xff]  ;;  %v503_v3 = vld [vmem:[#allocation9 + $0x78] sm:$0xff]  ;;  %v676_v5 = vld [vmem:[#allocation9 + $0x100] sm:$0xff] }
  0xf6   : > { %2669 = vmatpush3.bf16.msra.mxu0 %v2666_v14  ;;  %v2710_v1 = vpack.c.bf16 %v501_v0, %v500_v63  ;;  %v2714_v4 = vpack.c.bf16 %v503_v3, %v502_v2  ;;  %v677_v6 = vld [vmem:[#allocation9 + $0x108] sm:$0xff]  ;;  %v678_v8 = vld [vmem:[#allocation9 + $0x110] sm:$0xff]  ;;  %v679_v9 = vld [vmem:[#allocation9 + $0x118] sm:$0xff] }
  0xf7   : > { %2671 = vmatprep.subr.bf16.mxu0 %v2670_v17  ;;  %v2718_v7 = vpack.c.bf16 %v677_v6, %v676_v5  ;;  %v487_v11 = vld [vmem:[#allocation2 + $0xe] sm:$0xff]  ;;  %v2722_v12 = vpack.c.bf16 %v679_v9, %v678_v8  ;;  %v680_v14 = vld [vmem:[#allocation9 + $0x120] sm:$0xff]  ;;  %v681_v15 = vld [vmem:[#allocation9 + $0x128] sm:$0xff] }
  0xf8   : > { %2761 = vmatpush3.bf16.msra.mxu1 %v2758_v36  ;;  %v2726_v16 = vpack.c.bf16 %v681_v15, %v680_v14  ;;  %v683_v18 = vld [vmem:[#allocation9 + $0x138] sm:$0xff]  ;;  %v684_v20 = vld [vmem:[#allocation9 + $0x140] sm:$0xff]  ;;  %v685_v21 = vld [vmem:[#allocation9 + $0x148] sm:$0xff] }
  0xf9   : > { %2763 = vmatprep.subr.bf16.mxu1 %v2762_v42  ;;  %v686_v23 = vld [vmem:[#allocation9 + $0x150] sm:$0xff]  ;;  %v687_v24 = vld [vmem:[#allocation9 + $0x158] sm:$0xff]  ;;  %v688_v26 = vld [vmem:[#allocation9 + $0x160] sm:$0xff] }
  0xfa   : > { %2673 = vmatpush3.bf16.msra.mxu0 %v2670_v17  ;;  %v682_v17 = vld [vmem:[#allocation9 + $0x130] sm:$0xff]  ;;  %v2738_v25 = vpack.c.bf16 %v687_v24, %v686_v23  ;;  %v689_v27 = vld [vmem:[#allocation9 + $0x168] sm:$0xff]  ;;  %v691_v30 = vld [vmem:[#allocation9 + $0x178] sm:$0xff] }
  0xfb   : > { %2675 = vmatprep.subr.bf16.mxu0 %v2674_v22  ;;  %v2742_v28 = vpack.c.bf16 %v689_v27, %v688_v26  ;;  %v690_v29 = vld [vmem:[#allocation9 + $0x170] sm:$0xff]  ;;  %v815_v35 = vld [vmem:[#allocation11 + $0xe0] sm:$0xff]  ;;  %v816_v36 = vld [vmem:[#allocation11 + $0xe8] sm:$0xff] }
  0xfc   : > { %2765 = vmatpush3.bf16.msra.mxu1 %v2762_v42  ;;  %v2746_v31 = vpack.c.bf16 %v691_v30, %v690_v29  ;;  %v813_v32 = vld [vmem:[#allocation11 + $0xd0] sm:$0xff]  ;;  %v2774_v37 = vpack.c.bf16 %v816_v36, %v815_v35  ;;  %v784_v41 = vld [vmem:[#allocation11] sm:$0xff]  ;;  %v785_v42 = vld [vmem:[#allocation11 + $0x8] sm:$0xff] }
  0xfd   : > { %2767 = vmatprep.subr.bf16.mxu1 %v2766_v48  ;;  %v817_v38 = vld [vmem:[#allocation11 + $0xf0] sm:$0xff]  ;;  %v2782_v43 = vpack.c.bf16 %v785_v42, %v784_v41  ;;  %v1196_v44 = vld [vmem:[#allocation14 + $0x80] sm:$0xff]  ;;  %v1201_v51 = vld [vmem:[#allocation14 + $0xa8] sm:$0xff] }
  0xfe   : > { %2677 = vmatpush3.bf16.msra.mxu0 %v2674_v22  ;;  %v2734_v22 = vpack.c.bf16 %v685_v21, %v684_v20  ;;  %v1198_v46 = vld [vmem:[#allocation14 + $0x90] sm:$0xff]  ;;  %v1203_v54 = vld [vmem:[#allocation14 + $0xb8] sm:$0xff]  ;;  %v1205_v57 = vld [vmem:[#allocation14 + $0xc8] sm:$0xff] }
  0xff   : > { %2679 = vmatprep.subr.bf16.mxu0 %v2678_v33  ;;  %v786_v2 = vld [vmem:[#allocation11 + $0x10] sm:$0xff]  ;;  %v787_v3 = vld [vmem:[#allocation11 + $0x18] sm:$0xff]  ;;  %v788_v8 = vld [vmem:[#allocation11 + $0x20] sm:$0xff] }
 0x100   : > { %2769 = vmatpush3.bf16.msra.mxu1 %v2766_v48  ;;  %v1199_v48 = vld [vmem:[#allocation14 + $0x98] sm:$0xff]  ;;  %v789_v9 = vld [vmem:[#allocation11 + $0x28] sm:$0xff]  ;;  %v976_v35 = vld [vmem:[#allocation11 + $0x120] sm:$0xff] }
 0x101   : > { %v791_v14 = vld [vmem:[#allocation11 + $0x38] sm:$0xff]  ;;  %v797_v23 = vld [vmem:[#allocation11 + $0x68] sm:$0xff]  ;;  %v980_v41 = vld [vmem:[#allocation11 + $0x140] sm:$0xff] }
 0x102   : > { %2681 = vmatpush3.bf16.msra.mxu0 %v2678_v33  ;;  %v814_v33 = vld [vmem:[#allocation11 + $0xd8] sm:$0xff]  ;;  %v973_v29 = vld [vmem:[#allocation11 + $0x108] sm:$0xff] }
 0x103   : > { %2683 = vmatprep.subr.bf16.mxu0 %v2682_v39  ;;  %v2770_v34 = vpack.c.bf16 %v814_v33, %v813_v32  ;;  %v795_v20 = vld [vmem:[#allocation11 + $0x58] sm:$0xff]  ;;  %v977_v36 = vld [vmem:[#allocation11 + $0x128] sm:$0xff] }
 0x104   : > { %v799_v26 = vld [vmem:[#allocation11 + $0x78] sm:$0xff]  ;;  %v981_v42 = vld [vmem:[#allocation11 + $0x148] sm:$0xff] }
 0x105   : > { %2771 = vmatprep.subr.bf16.mxu1 %v2770_v34  ;;  %v975_v32 = vld [vmem:[#allocation11 + $0x118] sm:$0xff] }
 0x106   : > { %2685 = vmatpush3.bf16.msra.mxu0 %v2682_v39  ;;  %2773 = vmatpush3.bf16.msra.mxu1 %v2770_v34  ;;  %v818_v39 = vld [vmem:[#allocation11 + $0xf8] sm:$0xff] }
 0x107   : > { %2687 = vmatprep.subr.bf16.mxu0 %v2686_v45  ;;  %2775 = vmatprep.subr.bf16.mxu1 %v2774_v37  ;;  %v2778_v40 = vpack.c.bf16 %v818_v39, %v817_v38  ;;  %v978_v38 = vld [vmem:[#allocation11 + $0x130] sm:$0xff]  ;;  %v979_v39 = vld [vmem:[#allocation11 + $0x138] sm:$0xff] }
 0x109   : > { %2232 = vmatmul.mubr.f32.vlgmr.msra.gmra.mrb[0].mxu0 %v505_v49  ;;  %v2882_v49 = vpack.c.bf16 %v1199_v48, %v1198_v46  ;;  %v985_v48 = vld [vmem:[#allocation11 + $0x168] sm:$0xff] }
 0x10a   : > { %2689 = vmatpush3.bf16.msra.mxu0 %v2686_v45  ;;  %2266 = vmatprep.mubr.f32.mxu0 %v486_v19  ;;  %v2730_v19 = vpack.c.bf16 %v683_v18, %v682_v17  ;;  %v1197_v45 = vld [vmem:[#allocation14 + $0x88] sm:$0xff] }
 0x10b   : > { %2691 = vmatprep.subr.bf16.mxu0 %v2690_v50  ;;  %2777 = vmatpush3.bf16.msra.mxu1 %v2774_v37  ;;  %v2878_v47 = vpack.c.bf16 %v1197_v45, %v1196_v44  ;;  %v793_v17 = vld [vmem:[#allocation11 + $0x48] sm:$0xff]  ;;  %v2822_v37 = vpack.c.bf16 %v977_v36, %v976_v35  ;;  %v982_v44 = vld [vmem:[#allocation11 + $0x150] sm:$0xff]  ;;  %v983_v45 = vld [vmem:[#allocation11 + $0x158] sm:$0xff] }
 0x10c   : > { %2779 = vmatprep.subr.bf16.mxu1 %v2778_v40  ;;  %v2834_v46 = vpack.c.bf16 %v983_v45, %v982_v44  ;;  %v1499_v35 = vld [vmem:[#allocation15 + $0xb8] sm:$0xff] }
 0x10e   : > { %2693 = vmatpush3.bf16.msra.mxu0 %v2690_v50  ;;  %v1200_v50 = vld [vmem:[#allocation14 + $0xa0] sm:$0xff] }
 0x10f   : > { %2695 = vmatprep.subr.bf16.mxu0 %v2694_v53  ;;  %2781 = vmatpush3.bf16.msra.mxu1 %v2778_v40  ;;  %v2886_v52 = vpack.c.bf16 %v1201_v51, %v1200_v50  ;;  %v2826_v40 = vpack.c.bf16 %v979_v39, %v978_v38  ;;  %v986_v50 = vld [vmem:[#allocation11 + $0x170] sm:$0xff]  ;;  %v987_v51 = vld [vmem:[#allocation11 + $0x178] sm:$0xff]  ;;  %v1501_v38 = vld [vmem:[#allocation15 + $0xc8] sm:$0xff] }
 0x110   : > { %2783 = vmatprep.subr.bf16.mxu1 %v2782_v43 }
 0x112   : > { %2697 = vmatpush3.bf16.msra.mxu0 %v2694_v53  ;;  %v1202_v53 = vld [vmem:[#allocation14 + $0xb0] sm:$0xff] }
 0x113   : > { %2699 = vmatprep.subr.bf16.mxu0 %v2698_v56  ;;  %v2890_v55 = vpack.c.bf16 %v1203_v54, %v1202_v53  ;;  %v1074_v53 = vld [vmem:[#allocation12] sm:$0xff]  ;;  %v1075_v54 = vld [vmem:[#allocation12 + $0x8] sm:$0xff] }
 0x116   : > { %2701 = vmatpush3.bf16.msra.mxu0 %v2698_v56  ;;  %v1204_v56 = vld [vmem:[#allocation14 + $0xc0] sm:$0xff] }
 0x117   : > { %2703 = vmatprep.subr.bf16.mxu0 %v2702_v59  ;;  %v2894_v58 = vpack.c.bf16 %v1205_v57, %v1204_v56  ;;  %v1076_v56 = vld [vmem:[#allocation12 + $0x10] sm:$0xff]  ;;  %v1077_v57 = vld [vmem:[#allocation12 + $0x18] sm:$0xff] }
 0x11a   : > { %2705 = vmatpush3.bf16.msra.mxu0 %v2702_v59  ;;  %v1955_v59 = vld [vmem:[%s4040_s11] ss:$0 sm:$0xff]  ;;  %s1795_s11 = sshll.u32 %s3876_s6, 4  ;;  %s3936_s11 = int_to_ptr.vmem [resolvable:$true] %s1795_s11 }
 0x11b   : > { %2707 = vmatprep.subr.bf16.mxu0 %v2706_v62  ;;  %s3394_s12 = scalar_lea.vmem %s3936_s11, 256 }
 0x11c   : > { %p3395_p8 = scmp.ne.s32.totalorder %s3936_s11, %s3394_s12 }
 0x11e   : > { %2709 = vmatpush3.bf16.msra.mxu0 %v2706_v62  ;;  %p3396_p5 = pnand %p3395_p8, %p4046_p7 }
 0x11f   : > { %2711 = vmatprep.subr.bf16.mxu0 %v2710_v1 }
 0x120   : > { %p3397_p2 = pneg %p3396_p5 }
 0x122   : > { %2713 = vmatpush3.bf16.msra.mxu0 %v2710_v1 }
 0x123   : > { %2715 = vmatprep.subr.bf16.mxu0 %v2714_v4 }
 0x126   : > { %2717 = vmatpush3.bf16.msra.mxu0 %v2714_v4 }
 0x127   : > { %2719 = vmatprep.subr.bf16.mxu0 %v2718_v7 }
 0x129   : > { %2267 = vmatmul.mubr.f32.vlgmr.msra.gmra.mrb[0].mxu0 %v487_v11  ;;  %v2790_v11 = vpack.c.bf16 %v789_v9, %v788_v8  ;;  %v1087_v8 = vld [vmem:[#allocation12 + $0x68] sm:$0xff]  ;;  %v1088_v9 = vld [vmem:[#allocation12 + $0x70] sm:$0xff] }
 0x12a   : > { %2721 = vmatpush3.bf16.msra.mxu0 %v2718_v7  ;;  %2301 = vmatprep.mubr.f32.mxu0 %v3880_v10  ;;  %v2786_v7 = vpack.c.bf16 %v787_v3, %v786_v2  ;;  %v1082_v2 = vld [vmem:[#allocation12 + $0x40] sm:$0xff]  ;;  %v1083_v3 = vld [vmem:[#allocation12 + $0x48] sm:$0xff] }
 0x12b   : > { %2723 = vmatprep.subr.bf16.mxu0 %v2722_v12 }
 0x12e   : > { %2725 = vmatpush3.bf16.msra.mxu0 %v2722_v12  ;;  %v790_v12 = vld [vmem:[#allocation11 + $0x30] sm:$0xff] }
 0x12f   : > { %2727 = vmatprep.subr.bf16.mxu0 %v2726_v16  ;;  %v2794_v15 = vpack.c.bf16 %v791_v14, %v790_v12  ;;  %v1206_v14 = vld [vmem:[#allocation14 + $0xd0] sm:$0xff] }
 0x132   : > { %2729 = vmatpush3.bf16.msra.mxu0 %v2726_v16  ;;  %v792_v16 = vld [vmem:[#allocation11 + $0x40] sm:$0xff] }
 0x133   : > { %2731 = vmatprep.subr.bf16.mxu0 %v2730_v19  ;;  %v2798_v18 = vpack.c.bf16 %v793_v17, %v792_v16  ;;  %v1208_v17 = vld [vmem:[#allocation14 + $0xe0] sm:$0xff] }
 0x136   : > { %2733 = vmatpush3.bf16.msra.mxu0 %v2730_v19  ;;  %v794_v19 = vld [vmem:[#allocation11 + $0x50] sm:$0xff] }
 0x137   : > { %2735 = vmatprep.subr.bf16.mxu0 %v2734_v22  ;;  %v2802_v21 = vpack.c.bf16 %v795_v20, %v794_v19  ;;  %v1210_v20 = vld [vmem:[#allocation14 + $0xf0] sm:$0xff] }
 0x13a   : > { %2737 = vmatpush3.bf16.msra.mxu0 %v2734_v22  ;;  %v796_v22 = vld [vmem:[#allocation11 + $0x60] sm:$0xff] }
 0x13b   : > { %2739 = vmatprep.subr.bf16.mxu0 %v2738_v25  ;;  %v2806_v24 = vpack.c.bf16 %v797_v23, %v796_v22  ;;  %v1177_v23 = vld [vmem:[#allocation14] sm:$0xff] }
 0x13e   : > { %2741 = vmatpush3.bf16.msra.mxu0 %v2738_v25  ;;  %v798_v25 = vld [vmem:[#allocation11 + $0x70] sm:$0xff] }
 0x13f   : > { %2743 = vmatprep.subr.bf16.mxu0 %v2742_v28  ;;  %v2810_v27 = vpack.c.bf16 %v799_v26, %v798_v25  ;;  %v1493_v26 = vld [vmem:[#allocation15 + $0x88] sm:$0xff] }
 0x142   : > { %2745 = vmatpush3.bf16.msra.mxu0 %v2742_v28  ;;  %v972_v28 = vld [vmem:[#allocation11 + $0x100] sm:$0xff] }
 0x143   : > { %2747 = vmatprep.subr.bf16.mxu0 %v2746_v31  ;;  %v2814_v30 = vpack.c.bf16 %v973_v29, %v972_v28  ;;  %v1495_v29 = vld [vmem:[#allocation15 + $0x98] sm:$0xff] }
 0x146   : > { %2749 = vmatpush3.bf16.msra.mxu0 %v2746_v31  ;;  %v974_v31 = vld [vmem:[#allocation11 + $0x110] sm:$0xff] }
 0x147   : > { %2879 = vmatprep.subr.bf16.mxu0 %v2878_v47  ;;  %v2818_v33 = vpack.c.bf16 %v975_v32, %v974_v31  ;;  %v1496_v31 = vld [vmem:[#allocation15 + $0xa0] sm:$0xff]  ;;  %v1497_v32 = vld [vmem:[#allocation15 + $0xa8] sm:$0xff] }
 0x149   : > { %2302 = vmatmul.mubr.f32.vlgmr.msra.gmra.mrb[0].mxu0 %v3884_v13 }
 0x14a   : > { %2881 = vmatpush3.bf16.msra.mxu0 %v2878_v47  ;;  %v984_v47 = vld [vmem:[#allocation11 + $0x160] sm:$0xff] }
 0x14b   : > { %2883 = vmatprep.subr.bf16.mxu0 %v2882_v49 }
 0x14e   : > { %2885 = vmatpush3.bf16.msra.mxu0 %v2882_v49  ;;  %v2838_v49 = vpack.c.bf16 %v985_v48, %v984_v47  ;;  %v1179_v48 = vld [vmem:[#allocation14 + $0x10] sm:$0xff] }
 0x14f   : > { %2887 = vmatprep.subr.bf16.mxu0 %v2886_v52 }
 0x152   : > { %2889 = vmatpush3.bf16.msra.mxu0 %v2886_v52  ;;  %v2842_v52 = vpack.c.bf16 %v987_v51, %v986_v50 }
 0x153   : > { %2891 = vmatprep.subr.bf16.mxu0 %v2890_v55 }
 0x156   : > { %2893 = vmatpush3.bf16.msra.mxu0 %v2890_v55  ;;  %v2846_v55 = vpack.c.bf16 %v1075_v54, %v1074_v53  ;;  %v1181_v54 = vld [vmem:[#allocation14 + $0x20] sm:$0xff] }
 0x157   : > { %2895 = vmatprep.subr.bf16.mxu0 %v2894_v58 }
 0x15a   : > { %2897 = vmatpush3.bf16.msra.mxu0 %v2894_v58  ;;  %v2850_v58 = vpack.c.bf16 %v1077_v57, %v1076_v56  ;;  %v1183_v57 = vld [vmem:[#allocation14 + $0x30] sm:$0xff] }
 0x21c   : > { %v2303_v60 = vpop.f32.mrb[0].mxu0 }
 0x21d   : > { %v777_v61 = vadd.f32 %v2303_v60, %v1955_v59  ;;  %v758_v62 = vpop.f32.mrb[1].mxu0  ;;  %v1079_v60 = vld [vmem:[#allocation12 + $0x28] sm:$0xff] }
 0x21e   : > { %v776_v63 = vadd.f32 %v1955_v59, %v758_v62  ;;  %v1078_v59 = vld [vmem:[#allocation12 + $0x20] sm:$0xff]  ;;  %v1080_v62 = vld [vmem:[#allocation12 + $0x30] sm:$0xff] }
 0x21f   : > { %v3893_v0 = vmax.f32 %v777_v61, 0.0  ;;  %v2854_v61 = vpack.c.bf16 %v1079_v60, %v1078_v59  ;;  %v1185_v60 = vld [vmem:[#allocation14 + $0x40] sm:$0xff] }
 0x220   : > { %v778_v1 = vmax.f32 %v776_v63, 0.0  ;;  %v1081_v63 = vld [vmem:[#allocation12 + $0x38] sm:$0xff] }
 0x221   : > { %781 = vst [vmem:[#allocation3 + $0x10] sm:$0xff] %v3893_v0 }
 0x222   : > { %780 = vst [vmem:[#allocation3 + $0x8] sm:$0xff] %v778_v1 }
 0x229   : > { %v800_v4 = vld [vmem:[#allocation3 + $0x6] sm:$0xff]  ;;  %v801_v5 = vld [vmem:[#allocation3 + $0xe] sm:$0xff] }
 0x22a   : > { %v782_v6 = vld [vmem:[#allocation3 + $0x4] sm:$0xff]  ;;  %2336 = vmatprep.mubr.f32.mxu1 %v800_v4  ;;  %v783_v34 = vld [vmem:[#allocation3 + $0xc] sm:$0xff]  ;;  %v2862_v4 = vpack.c.bf16 %v1083_v3, %v1082_v2 }
 0x22b   : > { %1172 = vst [vmem:[#allocation3] sm:$0xff] %v3893_v0  ;;  %2337 = vmatmul.mubr.f32.vlgmr.msra.gmra.mrb[0].mxu1 %v801_v5  ;;  %v1084_v5 = vld [vmem:[#allocation12 + $0x50] sm:$0xff]  ;;  %v1189_v3 = vld [vmem:[#allocation14 + $0x60] sm:$0xff] }
 0x22c   : > { %2785 = vmatpush3.bf16.msra.mxu1 %v2782_v43  ;;  %2371 = vmatprep.mubr.f32.mxu1 %v782_v6  ;;  %v2830_v43 = vpack.c.bf16 %v981_v42, %v980_v41  ;;  %v1085_v6 = vld [vmem:[#allocation12 + $0x58] sm:$0xff] }
 0x22d   : > { %2787 = vmatprep.subr.bf16.mxu1 %v2786_v7 }
 0x230   : > { %2789 = vmatpush3.bf16.msra.mxu1 %v2786_v7  ;;  %v1086_v7 = vld [vmem:[#allocation12 + $0x60] sm:$0xff] }
 0x231   : > { %2791 = vmatprep.subr.bf16.mxu1 %v2790_v11 }
 0x234   : > { %2793 = vmatpush3.bf16.msra.mxu1 %v2790_v11  ;;  %v1089_v11 = vld [vmem:[#allocation12 + $0x78] sm:$0xff] }
 0x235   : > { %2795 = vmatprep.subr.bf16.mxu1 %v2794_v15  ;;  %v2874_v12 = vpack.c.bf16 %v1089_v11, %v1088_v9  ;;  %v1367_v11 = vld [vmem:[#allocation14 + $0x110] sm:$0xff] }
 0x238   : > { %2797 = vmatpush3.bf16.msra.mxu1 %v2794_v15  ;;  %v1207_v15 = vld [vmem:[#allocation14 + $0xd8] sm:$0xff] }
 0x239   : > { %2799 = vmatprep.subr.bf16.mxu1 %v2798_v18  ;;  %v2898_v16 = vpack.c.bf16 %v1207_v15, %v1206_v14  ;;  %v1369_v15 = vld [vmem:[#allocation14 + $0x120] sm:$0xff] }
 0x23b   : > { %2899 = vmatprep.subr.bf16.mxu0 %v2898_v16 }
 0x23c   : > { %2801 = vmatpush3.bf16.msra.mxu1 %v2798_v18  ;;  %2901 = vmatpush3.bf16.msra.mxu0 %v2898_v16  ;;  %v1209_v18 = vld [vmem:[#allocation14 + $0xe8] sm:$0xff] }
 0x23d   : > { %2803 = vmatprep.subr.bf16.mxu1 %v2802_v21  ;;  %v2902_v19 = vpack.c.bf16 %v1209_v18, %v1208_v17  ;;  %v1370_v16 = vld [vmem:[#allocation14 + $0x128] sm:$0xff]  ;;  %v1371_v18 = vld [vmem:[#allocation14 + $0x130] sm:$0xff] }
 0x23e   : > { %v2950_v17 = vpack.c.bf16 %v1370_v16, %v1369_v15  ;;  %v1661_v16 = vld [vmem:[#allocation15 + $0x100] sm:$0xff] }
 0x23f   : > { %2903 = vmatprep.subr.bf16.mxu0 %v2902_v19 }
 0x240   : > { %2805 = vmatpush3.bf16.msra.mxu1 %v2802_v21  ;;  %v1211_v21 = vld [vmem:[#allocation14 + $0xf8] sm:$0xff]  ;;  %2905 = vmatpush3.bf16.msra.mxu0 %v2902_v19 }
 0x241   : > { %2807 = vmatprep.subr.bf16.mxu1 %v2806_v24  ;;  %v2906_v22 = vpack.c.bf16 %v1211_v21, %v1210_v20  ;;  %v1372_v19 = vld [vmem:[#allocation14 + $0x138] sm:$0xff]  ;;  %v1373_v21 = vld [vmem:[#allocation14 + $0x140] sm:$0xff] }
 0x242   : > { %v2954_v20 = vpack.c.bf16 %v1372_v19, %v1371_v18  ;;  %v1663_v19 = vld [vmem:[#allocation15 + $0x110] sm:$0xff] }
 0x243   : > { %2907 = vmatprep.subr.bf16.mxu0 %v2906_v22 }
 0x244   : > { %2809 = vmatpush3.bf16.msra.mxu1 %v2806_v24  ;;  %2909 = vmatpush3.bf16.msra.mxu0 %v2906_v22  ;;  %v1178_v24 = vld [vmem:[#allocation14 + $0x8] sm:$0xff] }
 0x245   : > { %2811 = vmatprep.subr.bf16.mxu1 %v2810_v27  ;;  %v2910_v25 = vpack.c.bf16 %v1178_v24, %v1177_v23  ;;  %v1374_v22 = vld [vmem:[#allocation14 + $0x148] sm:$0xff]  ;;  %v1375_v24 = vld [vmem:[#allocation14 + $0x150] sm:$0xff] }
 0x246   : > { %v2958_v23 = vpack.c.bf16 %v1374_v22, %v1373_v21  ;;  %v1665_v22 = vld [vmem:[#allocation15 + $0x120] sm:$0xff] }
 0x247   : > { %2911 = vmatprep.subr.bf16.mxu0 %v2910_v25 }
 0x248   : > { %2813 = vmatpush3.bf16.msra.mxu1 %v2810_v27  ;;  %v1494_v27 = vld [vmem:[#allocation15 + $0x90] sm:$0xff] }
 0x249   : > { %2815 = vmatprep.subr.bf16.mxu1 %v2814_v30 }
 0x24b   : > { %2372 = vmatmul.mubr.f32.vlgmr.msra.gmra.mrb[0].mxu1 %v783_v34  ;;  %v1498_v34 = vld [vmem:[#allocation15 + $0xb0] sm:$0xff] }
 0x24c   : > { %2817 = vmatpush3.bf16.msra.mxu1 %v2814_v30  ;;  %2406 = vmatprep.mubr.f32.mxu1 %v778_v1  ;;  %v2858_v1 = vpack.c.bf16 %v1081_v63, %v1080_v62  ;;  %v2978_v30 = vpack.c.bf16 %v1495_v29, %v1494_v27  ;;  %v2986_v36 = vpack.c.bf16 %v1499_v35, %v1498_v34  ;;  %v1187_v63 = vld [vmem:[#allocation14 + $0x50] sm:$0xff]  ;;  %v1378_v27 = vld [vmem:[#allocation14 + $0x168] sm:$0xff]  ;;  %v1504_v35 = vld [vmem:[#allocation15 + $0xe0] sm:$0xff] }
 0x24d   : > { %2819 = vmatprep.subr.bf16.mxu1 %v2818_v33  ;;  %v1379_v29 = vld [vmem:[#allocation14 + $0x170] sm:$0xff] }
 0x250   : > { %2821 = vmatpush3.bf16.msra.mxu1 %v2818_v33  ;;  %v2982_v33 = vpack.c.bf16 %v1497_v32, %v1496_v31  ;;  %v1502_v32 = vld [vmem:[#allocation15 + $0xd0] sm:$0xff] }
 0x251   : > { %2823 = vmatprep.subr.bf16.mxu1 %v2822_v37 }
 0x254   : > { %2825 = vmatpush3.bf16.msra.mxu1 %v2822_v37  ;;  %v1500_v37 = vld [vmem:[#allocation15 + $0xc0] sm:$0xff] }
 0x255   : > { %2827 = vmatprep.subr.bf16.mxu1 %v2826_v40  ;;  %v2990_v39 = vpack.c.bf16 %v1501_v38, %v1500_v37  ;;  %v1489_v38 = vld [vmem:[#allocation5 + $0xf] sm:$0xff] }
 0x258   : > { %2829 = vmatpush3.bf16.msra.mxu1 %v2826_v40  ;;  %v1956_v40 = vld [vmem:[%s4041_s21] ss:$0 sm:$0xff]  ;;  %s3934_s21 = scalar_lea.hbm %s4045_s2, %s1962_s23 }
 0x259   : > { %2831 = vmatprep.subr.bf16.mxu1 %v2830_v43 }
 0x25c   : > { %2833 = vmatpush3.bf16.msra.mxu1 %v2830_v43 }
 0x25d   : > { %2835 = vmatprep.subr.bf16.mxu1 %v2834_v46 }
 0x260   : > { %2837 = vmatpush3.bf16.msra.mxu1 %v2834_v46  ;;  %v1175_v46 = vld [vmem:[#allocation4 + $0x6] sm:$0xff] }
 0x261   : > { %2839 = vmatprep.subr.bf16.mxu1 %v2838_v49 }
 0x264   : > { %2841 = vmatpush3.bf16.msra.mxu1 %v2838_v49  ;;  %v1180_v49 = vld [vmem:[#allocation14 + $0x18] sm:$0xff] }
 0x265   : > { %2843 = vmatprep.subr.bf16.mxu1 %v2842_v52 }
 0x268   : > { %2845 = vmatpush3.bf16.msra.mxu1 %v2842_v52  ;;  %v2914_v52 = vpack.c.bf16 %v1180_v49, %v1179_v48  ;;  %v1771_v48 = vld [vmem:[#allocation5 + $0x10] sm:$0xff] }
 0x269   : > { %2847 = vmatprep.subr.bf16.mxu1 %v2846_v55  ;;  %v1957_v49 = vld [vmem:[%s4042_s4] ss:$0 sm:$0xff]  ;;  %s3515_s4 = smov [#allocation17]  }
 0x26a   : > { %s3398_s29 = sshll.u32 %s3515_s4, 4  ;;  %s3399_s29 = int_to_ptr.vmem [resolvable:$false] %s3398_s29 }
 0x26b   : > { %2407 = vmatmul.mubr.f32.vlgmr.msra.gmra.mrb[0].mxu1 %v3893_v0  ;;  %v2866_v0 = vpack.c.bf16 %v1085_v6, %v1084_v5  ;;  %v1191_v6 = vld [vmem:[#allocation14 + $0x70] sm:$0xff]  ;;  %s3400_s25 = scalar_lea.vmem %s3399_s29, 512  ;;  %p3401_p9 = scmp.lt.s32.totalorder %s3936_s11, %s3399_s29 }
 0x26c   : > { %2849 = vmatpush3.bf16.msra.mxu1 %v2846_v55  ;;  %2441 = vmatprep.mubr.f32.mxu1 %v3880_v10  ;;  %v2870_v10 = vpack.c.bf16 %v1087_v8, %v1086_v7  ;;  %v1182_v55 = vld [vmem:[#allocation14 + $0x28] sm:$0xff]  ;;  %v1365_v8 = vld [vmem:[#allocation14 + $0x100] sm:$0xff]  ;;  %p3402_p10 = scmp.lt.s32.totalorder %s3400_s25, %s3394_s12 }
 0x26d   : > { %2851 = vmatprep.subr.bf16.mxu1 %v2850_v58  ;;  %v2918_v56 = vpack.c.bf16 %v1182_v55, %v1181_v54  ;;  %v1472_v55 = vld [vmem:[#allocation5 + $0xe] sm:$0xff] }
 0x26e   : > { %p3403_p1 = por %p3402_p10, %p3401_p9 }
 0x270   : > { %2853 = vmatpush3.bf16.msra.mxu1 %v2850_v58  ;;  %v1184_v58 = vld [vmem:[#allocation14 + $0x38] sm:$0xff]  ;;  %p3404_p11 = pnand %p3403_p1, %p3397_p2 }
 0x271   : > { %2855 = vmatprep.subr.bf16.mxu1 %v2854_v61  ;;  %v2922_v59 = vpack.c.bf16 %v1184_v58, %v1183_v57  ;;  %v1475_v57 = vld [vmem:[#allocation15 + $0x10] sm:$0xff]  ;;  %v1476_v58 = vld [vmem:[#allocation15 + $0x18] sm:$0xff] }
 0x274   : > { %2857 = vmatpush3.bf16.msra.mxu1 %v2854_v61  ;;  %v1186_v61 = vld [vmem:[#allocation14 + $0x48] sm:$0xff] }
 0x275   : > { %2859 = vmatprep.subr.bf16.mxu1 %v2858_v1  ;;  %v2926_v62 = vpack.c.bf16 %v1186_v61, %v1185_v60  ;;  %v1477_v61 = vld [vmem:[#allocation15 + $0x20] sm:$0xff] }
 0x278   : > { %2861 = vmatpush3.bf16.msra.mxu1 %v2858_v1  ;;  %v1188_v1 = vld [vmem:[#allocation14 + $0x58] sm:$0xff] }
 0x279   : > { %2863 = vmatprep.subr.bf16.mxu1 %v2862_v4  ;;  %v2930_v2 = vpack.c.bf16 %v1188_v1, %v1187_v63  ;;  %v1479_v1 = vld [vmem:[#allocation15 + $0x30] sm:$0xff] }
 0x27c   : > { %2865 = vmatpush3.bf16.msra.mxu1 %v2862_v4  ;;  %v1190_v4 = vld [vmem:[#allocation14 + $0x68] sm:$0xff] }
 0x27d   : > { %2867 = vmatprep.subr.bf16.mxu1 %v2866_v0  ;;  %v2934_v5 = vpack.c.bf16 %v1190_v4, %v1189_v3  ;;  %v1481_v4 = vld [vmem:[#allocation15 + $0x40] sm:$0xff] }
 0x280   : > { %2869 = vmatpush3.bf16.msra.mxu1 %v2866_v0  ;;  %v1192_v0 = vld [vmem:[#allocation14 + $0x78] sm:$0xff] }
 0x281   : > { %2871 = vmatprep.subr.bf16.mxu1 %v2870_v10  ;;  %v2938_v7 = vpack.c.bf16 %v1192_v0, %v1191_v6  ;;  %v1483_v0 = vld [vmem:[#allocation15 + $0x50] sm:$0xff] }
 0x284   : > { %2873 = vmatpush3.bf16.msra.mxu1 %v2870_v10  ;;  %v1366_v10 = vld [vmem:[#allocation14 + $0x108] sm:$0xff] }
 0x285   : > { %2875 = vmatprep.subr.bf16.mxu1 %v2874_v12  ;;  %v2942_v9 = vpack.c.bf16 %v1366_v10, %v1365_v8  ;;  %v1485_v10 = vld [vmem:[#allocation15 + $0x60] sm:$0xff] }
 0x288   : > { %2877 = vmatpush3.bf16.msra.mxu1 %v2874_v12  ;;  %v1368_v12 = vld [vmem:[#allocation14 + $0x118] sm:$0xff] }
 0x289   : > { %v2946_v14 = vpack.c.bf16 %v1368_v12, %v1367_v11  ;;  %v1487_v12 = vld [vmem:[#allocation15 + $0x70] sm:$0xff] }
 0x28b   : > { %2442 = vmatmul.mubr.f32.vlgmr.msra.gmra.mrb[0].mxu1 %v3884_v13  ;;  %v1492_v13 = vld [vmem:[#allocation15 + $0x80] sm:$0xff] }
 0x28c   : > { %v2974_v28 = vpack.c.bf16 %v1493_v26, %v1492_v13  ;;  %v1377_v26 = vld [vmem:[#allocation14 + $0x160] sm:$0xff]  ;;  %2581 = vmatprep.mubr.f32.mxu1 %v1489_v38 }
 0x28e   : > { %2975 = vmatprep.subr.bf16.mxu1 %v2974_v28 }
 0x28f   : > { %2977 = vmatpush3.bf16.msra.mxu1 %v2974_v28  ;;  %v2966_v28 = vpack.c.bf16 %v1378_v27, %v1377_v26  ;;  %v1669_v27 = vld [vmem:[#allocation15 + $0x140] sm:$0xff] }
 0x290   : > { %2979 = vmatprep.subr.bf16.mxu1 %v2978_v30 }
 0x293   : > { %2981 = vmatpush3.bf16.msra.mxu1 %v2978_v30  ;;  %v1380_v30 = vld [vmem:[#allocation14 + $0x178] sm:$0xff] }
 0x294   : > { %2983 = vmatprep.subr.bf16.mxu1 %v2982_v33  ;;  %v2970_v31 = vpack.c.bf16 %v1380_v30, %v1379_v29  ;;  %v1671_v30 = vld [vmem:[#allocation15 + $0x150] sm:$0xff] }
 0x297   : > { %2985 = vmatpush3.bf16.msra.mxu1 %v2982_v33  ;;  %v1503_v33 = vld [vmem:[#allocation15 + $0xd8] sm:$0xff] }
 0x298   : > { %2987 = vmatprep.subr.bf16.mxu1 %v2986_v36  ;;  %v2994_v34 = vpack.c.bf16 %v1503_v33, %v1502_v32  ;;  %v1673_v33 = vld [vmem:[#allocation15 + $0x160] sm:$0xff] }
 0x29b   : > { %2989 = vmatpush3.bf16.msra.mxu1 %v2986_v36  ;;  %v1505_v36 = vld [vmem:[#allocation15 + $0xe8] sm:$0xff] }
 0x29c   : > { %2991 = vmatprep.subr.bf16.mxu1 %v2990_v39  ;;  %v2998_v37 = vpack.c.bf16 %v1505_v36, %v1504_v35  ;;  %v1675_v36 = vld [vmem:[#allocation15 + $0x170] sm:$0xff] }
 0x29f   : > { %2993 = vmatpush3.bf16.msra.mxu1 %v2990_v39  ;;  %v1506_v39 = vld [vmem:[#allocation15 + $0xf0] sm:$0xff] }
 0x2a0   : > { %2995 = vmatprep.subr.bf16.mxu1 %v2994_v34 }
 0x2a3   : > { %2997 = vmatpush3.bf16.msra.mxu1 %v2994_v34  ;;  %v1674_v34 = vld [vmem:[#allocation15 + $0x168] sm:$0xff] }
 0x2a4   : > { %2999 = vmatprep.subr.bf16.mxu1 %v2998_v37  ;;  %v3062_v35 = vpack.c.bf16 %v1674_v34, %v1673_v33 }
 0x2a7   : > { %3001 = vmatpush3.bf16.msra.mxu1 %v2998_v37  ;;  %v1676_v37 = vld [vmem:[#allocation15 + $0x178] sm:$0xff] }
 0x2a8   : > { %v3066_v38 = vpack.c.bf16 %v1676_v37, %v1675_v36 }
 0x35e   : > { %v2443_v41 = vpop.f32.mrb[0].mxu1 }
 0x35f   : > { %v3070_v42 = vadd.f32 %v2443_v41, %v1956_v40  ;;  %v1156_v43 = vpop.f32.mrb[1].mxu1  ;;  %v1473_v41 = vld [vmem:[#allocation15] sm:$0xff] }
 0x360   : > { %v3071_v44 = vadd.f32 %v1956_v40, %v1156_v43  ;;  %v1507_v40 = vld [vmem:[#allocation15 + $0xf8] sm:$0xff]  ;;  %v1474_v43 = vld [vmem:[#allocation15 + $0x8] sm:$0xff] }
 0x361   : > { %v3903_v45 = vmax.f32 %v3070_v42, 0.0  ;;  %v3002_v42 = vpack.c.bf16 %v1507_v40, %v1506_v39  ;;  %v1958_v39 = vld [vmem:[%s4044_s9] ss:$0 sm:$0xff] }
 0x362   : > { %v3905_v47 = vmax.f32 %v3071_v44, 0.0  ;;  %v3006_v44 = vpack.c.bf16 %v1474_v43, %v1473_v41 }
 0x363   : > { %1174 = vst [vmem:[#allocation4 + $0x18] sm:$0xff] %v3903_v45  ;;  %3003 = vmatprep.subr.bf16.mxu1 %v3002_v42 }
 0x364   : > { %1173 = vst [vmem:[#allocation4 + $0x10] sm:$0xff] %v3905_v47  ;;  %1769 = vst [vmem:[#allocation4] sm:$0xff] %v3905_v47  ;;  %3005 = vmatpush3.bf16.msra.mxu1 %v3002_v42 }
 0x365   : > { %3007 = vmatprep.subr.bf16.mxu1 %v3006_v44 }
 0x36b   : > { %v1193_v50 = vld [vmem:[#allocation4 + $0xb] sm:$0xff]  ;;  %v1194_v51 = vld [vmem:[#allocation4 + $0x13] sm:$0xff] }
 0x36c   : > { %v1176_v53 = vld [vmem:[#allocation4 + $0xe] sm:$0xff]  ;;  %2476 = vmatprep.mubr.f32.mxu0 %v1193_v50 }
 0x36d   : > { %1770 = vst [vmem:[#allocation4 + $0x8] sm:$0xff] %v3903_v45  ;;  %2477 = vmatmul.mubr.f32.vlgmr.msra.gmra.mrb[2].mxu0 %v1194_v51 }
 0x36e   : > { %2913 = vmatpush3.bf16.msra.mxu0 %v2910_v25  ;;  %2511 = vmatprep.mubr.f32.mxu0 %v1175_v46  ;;  %v1376_v25 = vld [vmem:[#allocation14 + $0x158] sm:$0xff] }
 0x36f   : > { %2915 = vmatprep.subr.bf16.mxu0 %v2914_v52  ;;  %v2962_v13 = vpack.c.bf16 %v1376_v25, %v1375_v24  ;;  %v1471_v46 = vld [vmem:[#allocation5 + $0x6] sm:$0xff]  ;;  %v1667_v25 = vld [vmem:[#allocation15 + $0x130] sm:$0xff] }
 0x370   : > { %1774 = vst [vmem:[#allocation5] sm:$0xff] %v1771_v48 }
 0x372   : > { %2917 = vmatpush3.bf16.msra.mxu0 %v2914_v52 }
 0x373   : > { %2919 = vmatprep.subr.bf16.mxu0 %v2918_v56 }
 0x376   : > { %2921 = vmatpush3.bf16.msra.mxu0 %v2918_v56 }
 0x377   : > { %2923 = vmatprep.subr.bf16.mxu0 %v2922_v59 }
 0x37a   : > { %2925 = vmatpush3.bf16.msra.mxu0 %v2922_v59  ;;  %v3010_v59 = vpack.c.bf16 %v1476_v58, %v1475_v57 }
 0x37b   : > { %2927 = vmatprep.subr.bf16.mxu0 %v2926_v62 }
 0x37e   : > { %2929 = vmatpush3.bf16.msra.mxu0 %v2926_v62  ;;  %v1478_v62 = vld [vmem:[#allocation15 + $0x28] sm:$0xff] }
 0x37f   : > { %2931 = vmatprep.subr.bf16.mxu0 %v2930_v2  ;;  %v3014_v63 = vpack.c.bf16 %v1478_v62, %v1477_v61 }
 0x382   : > { %2933 = vmatpush3.bf16.msra.mxu0 %v2930_v2  ;;  %v1480_v2 = vld [vmem:[#allocation15 + $0x38] sm:$0xff] }
 0x383   : > { %2935 = vmatprep.subr.bf16.mxu0 %v2934_v5  ;;  %v3018_v3 = vpack.c.bf16 %v1480_v2, %v1479_v1 }
 0x386   : > { %2937 = vmatpush3.bf16.msra.mxu0 %v2934_v5  ;;  %v1482_v5 = vld [vmem:[#allocation15 + $0x48] sm:$0xff] }
 0x387   : > { %2939 = vmatprep.subr.bf16.mxu0 %v2938_v7  ;;  %v3022_v6 = vpack.c.bf16 %v1482_v5, %v1481_v4 }
 0x38a   : > { %2941 = vmatpush3.bf16.msra.mxu0 %v2938_v7  ;;  %v1484_v7 = vld [vmem:[#allocation15 + $0x58] sm:$0xff] }
 0x38b   : > { %2943 = vmatprep.subr.bf16.mxu0 %v2942_v9  ;;  %v3026_v8 = vpack.c.bf16 %v1484_v7, %v1483_v0 }
 0x38d   : > { %2512 = vmatmul.mubr.f32.vlgmr.msra.gmra.mrb[2].mxu0 %v1176_v53 }
 0x38e   : > { %2945 = vmatpush3.bf16.msra.mxu0 %v2942_v9  ;;  %2546 = vmatprep.mubr.f32.mxu0 %v3905_v47  ;;  %v1486_v9 = vld [vmem:[#allocation15 + $0x68] sm:$0xff] }
 0x38f   : > { %2947 = vmatprep.subr.bf16.mxu0 %v2946_v14  ;;  %v3030_v11 = vpack.c.bf16 %v1486_v9, %v1485_v10 }
 0x392   : > { %2949 = vmatpush3.bf16.msra.mxu0 %v2946_v14  ;;  %v1488_v14 = vld [vmem:[#allocation15 + $0x78] sm:$0xff] }
 0x393   : > { %2951 = vmatprep.subr.bf16.mxu0 %v2950_v17  ;;  %v3034_v15 = vpack.c.bf16 %v1488_v14, %v1487_v12 }
 0x396   : > { %2953 = vmatpush3.bf16.msra.mxu0 %v2950_v17  ;;  %v1662_v17 = vld [vmem:[#allocation15 + $0x108] sm:$0xff] }
 0x397   : > { %2955 = vmatprep.subr.bf16.mxu0 %v2954_v20  ;;  %v3038_v18 = vpack.c.bf16 %v1662_v17, %v1661_v16 }
 0x39a   : > { %2957 = vmatpush3.bf16.msra.mxu0 %v2954_v20  ;;  %v1664_v20 = vld [vmem:[#allocation15 + $0x118] sm:$0xff] }
 0x39b   : > { %2959 = vmatprep.subr.bf16.mxu0 %v2958_v23  ;;  %v3042_v21 = vpack.c.bf16 %v1664_v20, %v1663_v19 }
 0x39e   : > { %2961 = vmatpush3.bf16.msra.mxu0 %v2958_v23  ;;  %v1666_v23 = vld [vmem:[#allocation15 + $0x128] sm:$0xff] }
 0x39f   : > { %2963 = vmatprep.subr.bf16.mxu0 %v2962_v13  ;;  %v3046_v24 = vpack.c.bf16 %v1666_v23, %v1665_v22 }
 0x3a2   : > { %2965 = vmatpush3.bf16.msra.mxu0 %v2962_v13  ;;  %v1668_v13 = vld [vmem:[#allocation15 + $0x138] sm:$0xff] }
 0x3a3   : > { %2967 = vmatprep.subr.bf16.mxu0 %v2966_v28  ;;  %v3050_v26 = vpack.c.bf16 %v1668_v13, %v1667_v25 }
 0x3a6   : > { %2969 = vmatpush3.bf16.msra.mxu0 %v2966_v28  ;;  %v1670_v28 = vld [vmem:[#allocation15 + $0x148] sm:$0xff] }
 0x3a7   : > { %2971 = vmatprep.subr.bf16.mxu0 %v2970_v31  ;;  %v3054_v29 = vpack.c.bf16 %v1670_v28, %v1669_v27 }
 0x3aa   : > { %2973 = vmatpush3.bf16.msra.mxu0 %v2970_v31  ;;  %v1672_v31 = vld [vmem:[#allocation15 + $0x158] sm:$0xff] }
 0x3ab   : > { %v3058_v32 = vpack.c.bf16 %v1672_v31, %v1671_v30 }
 0x3ad   : > { %2547 = vmatmul.mubr.f32.vlgmr.msra.gmra.mrb[2].mxu0 %v3903_v45 }
 0x480   : > { %v2548_v50 = vpop.f32.mrb[2].mxu0 }
 0x481   : > { %v3916_v51 = vadd.f32 %v2548_v50, %v1957_v49  ;;  %v1447_v52 = vpop.f32.mrb[3].mxu0 }
 0x482   : > { %v1465_v53 = vadd.f32 %v1957_v49, %v1447_v52 }
 0x483   : > { %v1468_v54 = vmax.f32 %v3916_v51, 0.0 }
 0x484   : > { %v1467_v56 = vmax.f32 %v1465_v53, 0.0 }
 0x486   : > { %1469 = vst [vmem:[#allocation5 + $0x18] sm:$0xff] %v1467_v56  ;;  %1775 = vst [vmem:[#allocation5 + $0x8] sm:$0xff] %v1467_v56 }
 0x48d   : > { %v1490_v60 = vld [vmem:[#allocation5 + $0x17] sm:$0xff] }
 0x48e   : > { %2582 = vmatmul.mubr.f32.vlgmr.msra.gmra.mrb[2].mxu1 %v1490_v60  ;;  %1776 = vst [vmem:[#allocation5 + $0x10] sm:$0xff] %v1468_v54 }
 0x48f   : > { %3009 = vmatpush3.bf16.msra.mxu1 %v3006_v44  ;;  %2616 = vmatprep.mubr.f32.mxu1 %v1471_v46 }
 0x490   : > { %3011 = vmatprep.subr.bf16.mxu1 %v3010_v59 }
 0x493   : > { %3013 = vmatpush3.bf16.msra.mxu1 %v3010_v59 }
 0x494   : > { %3015 = vmatprep.subr.bf16.mxu1 %v3014_v63 }
 0x497   : > { %3017 = vmatpush3.bf16.msra.mxu1 %v3014_v63 }
 0x498   : > { %3019 = vmatprep.subr.bf16.mxu1 %v3018_v3 }
 0x49b   : > { %3021 = vmatpush3.bf16.msra.mxu1 %v3018_v3 }
 0x49c   : > { %3023 = vmatprep.subr.bf16.mxu1 %v3022_v6 }
 0x49f   : > { %3025 = vmatpush3.bf16.msra.mxu1 %v3022_v6 }
 0x4a0   : > { %3027 = vmatprep.subr.bf16.mxu1 %v3026_v8 }
 0x4a3   : > { %3029 = vmatpush3.bf16.msra.mxu1 %v3026_v8 }
 0x4a4   : > { %3031 = vmatprep.subr.bf16.mxu1 %v3030_v11 }
 0x4a7   : > { %3033 = vmatpush3.bf16.msra.mxu1 %v3030_v11 }
 0x4a8   : > { %3035 = vmatprep.subr.bf16.mxu1 %v3034_v15 }
 0x4ab   : > { %3037 = vmatpush3.bf16.msra.mxu1 %v3034_v15 }
 0x4ac   : > { %3039 = vmatprep.subr.bf16.mxu1 %v3038_v18 }
 0x4ae   : > { %2617 = vmatmul.mubr.f32.vlgmr.msra.gmra.mrb[2].mxu1 %v1472_v55 }
 0x4af   : > { %3041 = vmatpush3.bf16.msra.mxu1 %v3038_v18  ;;  %2651 = vmatprep.mubr.f32.mxu1 %v1467_v56 }
 0x4b0   : > { %3043 = vmatprep.subr.bf16.mxu1 %v3042_v21 }
 0x4b3   : > { %3045 = vmatpush3.bf16.msra.mxu1 %v3042_v21 }
 0x4b4   : > { %3047 = vmatprep.subr.bf16.mxu1 %v3046_v24 }
 0x4b7   : > { %3049 = vmatpush3.bf16.msra.mxu1 %v3046_v24 }
 0x4b8   : > { %3051 = vmatprep.subr.bf16.mxu1 %v3050_v26 }
 0x4bb   : > { %3053 = vmatpush3.bf16.msra.mxu1 %v3050_v26 }
 0x4bc   : > { %3055 = vmatprep.subr.bf16.mxu1 %v3054_v29 }
 0x4bf   : > { %3057 = vmatpush3.bf16.msra.mxu1 %v3054_v29 }
 0x4c0   : > { %3059 = vmatprep.subr.bf16.mxu1 %v3058_v32 }
 0x4c3   : > { %3061 = vmatpush3.bf16.msra.mxu1 %v3058_v32 }
 0x4c4   : > { %3063 = vmatprep.subr.bf16.mxu1 %v3062_v35 }
 0x4c7   : > { %3065 = vmatpush3.bf16.msra.mxu1 %v3062_v35 }
 0x4c8   : > { %3067 = vmatprep.subr.bf16.mxu1 %v3066_v38 }
 0x4cb   : > { %3069 = vmatpush3.bf16.msra.mxu1 %v3066_v38 }
 0x4ce   : > { %2652 = vmatmul.mubr.f32.vlgmr.msra.gmra.mrb[2].mxu1 %v1468_v54 }
 0x5a1   : > { %v2653_v40 = vpop.f32.mrb[2].mxu1 }
 0x5a2   : > { %v1762_v41 = vadd.f32 %v2653_v40, %v1958_v39  ;;  %v1743_v42 = vpop.f32.mrb[3].mxu1 }
 0x5a3   : > { %v1761_v43 = vadd.f32 %v1958_v39, %v1743_v42 }
 0x5a4   : > { %v1764_v44 = vadd.f32 %v1762_v41, %v3903_v45 }
 0x5a5   : > { %v1763_v46 = vadd.f32 %v1761_v43, %v3905_v47 }
 0x5a6   : > { %v1766_v48 = vmax.f32 %v1764_v44, 0.0 }
 0x5a7   : > { %v1765_v49 = vmax.f32 %v1763_v46, 0.0 }
 0x5a8   : > { %1778 = vst [vmem:[%s3876_s6 + $0x8] sm:$0xff] %v1766_v48 }
 0x5a9   : > { %1777 = vst [vmem:[%s3876_s6] sm:$0xff] %v1765_v49 }
 0x5aa   : > { %3407 = shalt.err (!%p3404_p11)
}
 0x5ab   : > { %s3408_s6 = scalar_lea.hbm %s3934_s21, 256  ;;  %s3412_s5 = scalar_lea.hbm %s4045_s2, 1024 }
 0x5ac   : > { %p3409_p12 = scmp.ne.s32.totalorder %s3934_s21, %s3408_s6  ;;  %p3413_p3 = scmp.lt.u32.totalorder %s3934_s21, %s4045_s2 }
 0x5ad   : > { %p3414_p6 = scmp.lt.u32.totalorder %s3412_s5, %s3408_s6  ;;  %p3416_p8 = scmp.lt.u32.totalorder %s3408_s6, %s3934_s21 }
 0x5ae   : > { %p3410_p13 = pnand %p3409_p12, %p4046_p7 }
 0x5af   : > { %p3415_p4 = por %p3414_p6, %p3413_p3 }
 0x5b0   : > { %p3411_p0 = pneg %p3410_p13 }
 0x5b1   : > { %p3417_p5 = por %p3416_p8, %p3415_p4 }
 0x5b3   : > { %p3418_p2 = pnand %p3417_p5, %p3411_p0 }
 0x5b5   : > { %3421 = shalt.err (!%p3418_p2)
}
 0x5b6   : > { %s3516_s23 = smov 128   ;;  %s3517_s16 = smov 8  }
 0x5b7   : > { %3112 = dma.vmem_to_hbm [thread:$0]  (%p4046_p7), %s3936_s11, 256, %s3934_s21, %s1780_s28, %s3516_s23, %s3516_s23, %s3517_s16  }
 0x5b8 PF: > { %p3149_p9 = scmp.ge.s32.totalorder %s3504_s20, 2  ;;  %s1810_s24 = sand.u32 1, %s3476_s13  }
 0x5b9   : > { %p4047_p10 = scmp.ne.s32.totalorder %s4034_s10, 0  ;;  %s1811_s12 = scalar_lea.sflag [#allocation8], %s1810_s24 }
 0x5bb   : > { %p3135_p1 = pnand %p3149_p9, %p4047_p10 }
 0x5bd   : > { %3471 = dma.done.wait (!%p3135_p1), %s1811_s12, 256  }
 0x5be   : > { %3473 = vsyncadd (!%p3135_p1), %s1811_s12, 4294967040  ;;  %s29_s20 = sadd.s32 1, %s3504_s20   ;;  %s4048_s13 = smov %s3480_s14 }
 0x5bf   : > { %p26_p11 = scmp.ge.s32.totalorder %s29_s20, 6   ;;  %s4049_s14 = smov %s3484_s15 }
 0x5c0   : > { %s4050_s15 = smov %s3803_s30  ;;  %s4051_s16 = smov %s3496_s18 }
 0x5c1   : > { %s4052_s17 = smov %s3500_s19  ;;  %s4053_s18 = smov %s4056_s26 }
 0x5c2   : > { %s4054_s19 = smov %s4060_s1  ;;  %28 = sbr.rel (!%p26_p11) target bundleno = 20 (0x14), region = 137 }
 0x5c9   :  { %1816 = vsyncpa [#allocation7], 1 }
 0x5ca   :  { %1818 = vsyncpa [#allocation7 + $0x1], 1 }
 0x5cb   :  { %1819 = vsyncpa [#allocation10], 1 }
 0x5cc   :  { %1820 = vsyncpa [#allocation13], 1 }
 0x5cd   :  { %1821 = vsyncpa [#allocation16], 1 }
 0x5ce   :  { %1822 = vsyncpa [#allocation8], 1 }
 0x5cf   :  { %1824 = vsyncpa [#allocation8 + $0x1], 1 }

</bundles_post_ra>
